<compile_context>
chip_gen: v6e
topology: v6e:2x2x1
jax: 0.10.0
libtpu: 0.0.40
codegen_flags: <defaults>
</compile_context>

<pallas_src>
import functools
import math

import jax
import jax.numpy as jnp
from jax.experimental import pallas as pl
from jax.experimental.pallas import tpu as pltpu


def _round_up(x, m):
    return (x + m - 1) // m * m


def _largest_divisor_tile(n, cap):
    """n if n <= cap, else the largest multiple-of-8 divisor of n that is <= cap (0 if none)."""
    if n <= cap:
        return n
    for d in range(cap - cap % 8, 7, -8):
        if n % d == 0:
            return d
    return 0


# ------------------------- fused matmul + BN + activation (full-K, bf16 out) -------------------------

def _mm_bn_act_kernel(a_ref, b_ref, s_ref, bias_ref, o_ref, *, act):
    y = jnp.dot(a_ref[...], b_ref[...], preferred_element_type=jnp.float32)
    y = y * s_ref[...] + bias_ref[...]
    if act == "relu":
        y = jnp.maximum(y, 0.0)
    o_ref[...] = y.astype(o_ref.dtype)


def matmul_bn_act(a, b, scale, bias, act="none", out_dtype=jnp.bfloat16, tm_cap=1024):
    """(M,K) @ (K,N) on the MXU (bf16 operands, f32 accum) + fused per-channel scale/bias + act.

    Full-K blocks (no K padding, no K grid axis); tm is an exact divisor of M when possible."""
    M, K = a.shape
    K2, N = b.shape
    assert K == K2
    a = a.astype(jnp.bfloat16)
    b = b.astype(jnp.bfloat16)

    tm = _largest_divisor_tile(M, tm_cap)
    if tm == 0:                                   # fallback (not hit by this network)
        tm = tm_cap
        Mp = _round_up(M, tm)
        a = jnp.pad(a, ((0, Mp - M), (0, 0)))
    else:
        Mp = M
    tn = N if N <= 256 else (256 if N % 256 == 0 else N)

    s2 = scale.reshape(1, N).astype(jnp.float32)
    b2 = bias.reshape(1, N).astype(jnp.float32)

    out = pl.pallas_call(
        functools.partial(_mm_bn_act_kernel, act=act),
        out_shape=jax.ShapeDtypeStruct((Mp, N), out_dtype),
        grid=(Mp // tm, N // tn),
        in_specs=[
            pl.BlockSpec((tm, K), lambda i, j: (i, 0)),
            pl.BlockSpec((K, tn), lambda i, j: (0, j)),
            pl.BlockSpec((1, tn), lambda i, j: (0, j)),
            pl.BlockSpec((1, tn), lambda i, j: (0, j)),
        ],
        out_specs=pl.BlockSpec((tm, tn), lambda i, j: (i, j)),
        compiler_params=pltpu.CompilerParams(
            dimension_semantics=("parallel", "parallel")),
    )(a, b, s2, b2)
    return out[:M] if Mp != M else out


# ------------------------- fused 3x3 stride-1 conv + BN + activation -------------------------

def _conv3x3_kernel(x_ref, w_ref, s_ref, b_ref, o_ref, *, wp, m_rows, act):
    # x_ref: (1, Lp, Cin) flattened padded image; tap (kh,kw) is the contiguous row
    # window starting at kh*wp + kw.  Accumulate the 9 taps in f32.
    cout_t = o_ref.shape[2]
    acc = jnp.zeros((m_rows, cout_t), jnp.float32)
    for kh in range(3):
        for kw in range(3):
            a = x_ref[0, pl.ds(kh * wp + kw, m_rows), :]
            acc += jnp.dot(a, w_ref[kh * 3 + kw],
                           preferred_element_type=jnp.float32)
    y = acc * s_ref[...] + b_ref[...]
    if act == "relu":
        y = jnp.maximum(y, 0.0)
    o_ref[0] = y.astype(o_ref.dtype)


def conv3x3_s1_bn_act(x, w, scale, bias, act="relu"):
    """3x3 / stride-1 / pad-1 conv, NHWC, fused BN + activation, no im2col materialization."""
    N, H, W, Cin = x.shape
    Cout = w.shape[0]
    Wp = W + 2
    Lp = (H + 3) * Wp                 # pad: 1 top, 2 bottom (extra row keeps tap reads in-bounds)
    m_rows = H * Wp                   # output rows computed at padded width (2 junk cols/row)

    x_flat = jnp.pad(x.astype(jnp.bfloat16),
                     ((0, 0), (1, 2), (1, 1), (0, 0))).reshape(N, Lp, Cin)
    w_taps = jnp.transpose(w.astype(jnp.bfloat16), (2, 3, 1, 0)).reshape(9, Cin, Cout)
    tcout = Cout if Cout <= 256 else 256

    out = pl.pallas_call(
        functools.partial(_conv3x3_kernel, wp=Wp, m_rows=m_rows, act=act),
        out_shape=jax.ShapeDtypeStruct((N, m_rows, Cout), jnp.bfloat16),
        grid=(N, Cout // tcout),
        in_specs=[
            pl.BlockSpec((1, Lp, Cin), lambda n, j: (n, 0, 0)),
            pl.BlockSpec((9, Cin, tcout), lambda n, j: (0, 0, j)),
            pl.BlockSpec((1, tcout), lambda n, j: (0, j)),
            pl.BlockSpec((1, tcout), lambda n, j: (0, j)),
        ],
        out_specs=pl.BlockSpec((1, m_rows, tcout), lambda n, j: (n, 0, j)),
        compiler_params=pltpu.CompilerParams(
            dimension_semantics=("parallel", "parallel")),
    )(x_flat, w_taps,
      scale.reshape(1, Cout).astype(jnp.float32),
      bias.reshape(1, Cout).astype(jnp.float32))
    # drop the 2 junk columns per output row introduced by the flattened-row trick
    return out.reshape(N, H, Wp, Cout)[:, :, :W, :]


# ------------------------- SE branch: fused squeeze + excite -------------------------

def _se_gate_kernel(x_ref, w1_ref, b1_ref, w2_ref, b2_ref, o_ref, acc_ref, *, inv_hw):
    @pl.when(pl.program_id(1) == 0)
    def _():
        acc_ref[...] = jnp.zeros_like(acc_ref)

    acc_ref[...] += jnp.sum(x_ref[0].astype(jnp.float32), axis=0, keepdims=True)

    @pl.when(pl.program_id(1) == pl.num_programs(1) - 1)
    def _():
        pooled = acc_ref[...] * inv_hw                                       # (1, C) f32
        h = jnp.maximum(
            jnp.dot(pooled, w1_ref[...], preferred_element_type=jnp.float32)
            + b1_ref[...], 0.0)                                              # (1, Cmid)
        g = jax.nn.sigmoid(
            jnp.dot(h, w2_ref[...], preferred_element_type=jnp.float32)
            + b2_ref[...])                                                   # (1, C)
        o_ref[...] = g.reshape(1, 1, -1)


def se_gate(x, w1, b1, w2, b2):
    """x: (N, HW, C) bf16; w1: (C, Cmid); w2: (Cmid, C). Returns gate (N, 1, C) f32."""
    N, HW, C = x.shape
    Cmid = w1.shape[1]
    t = _largest_divisor_tile(HW, 1024)
    if t == 0:
        t = HW
    return pl.pallas_call(
        functools.partial(_se_gate_kernel, inv_hw=1.0 / HW),
        out_shape=jax.ShapeDtypeStruct((N, 1, C), jnp.float32),
        grid=(N, HW // t),
        in_specs=[
            pl.BlockSpec((1, t, C), lambda i, j: (i, j, 0)),
            pl.BlockSpec((C, Cmid), lambda i, j: (0, 0)),
            pl.BlockSpec((1, Cmid), lambda i, j: (0, 0)),
            pl.BlockSpec((Cmid, C), lambda i, j: (0, 0)),
            pl.BlockSpec((1, C), lambda i, j: (0, 0)),
        ],
        out_specs=pl.BlockSpec((1, 1, C), lambda i, j: (i, 0, 0)),
        scratch_shapes=[pltpu.VMEM((1, C), jnp.float32)],
        compiler_params=pltpu.CompilerParams(
            dimension_semantics=("parallel", "arbitrary")),
    )(x, w1.astype(jnp.float32), b1.astype(jnp.float32),
      w2.astype(jnp.float32), b2.astype(jnp.float32))


def _se_scale_kernel(x_ref, g_ref, r_ref, o_ref):
    y = x_ref[...].astype(jnp.float32) * g_ref[...] + r_ref[...].astype(jnp.float32)
    o_ref[...] = jnp.maximum(y, 0.0).astype(o_ref.dtype)


def se_scale_add_relu(x, gate, resid):
    """out = relu(x * gate + resid); x, resid: (N, HW, C) bf16; gate: (N, 1, C) f32."""
    N, HW, C = x.shape
    x = x.astype(jnp.bfloat16)
    resid = resid.astype(jnp.bfloat16)
    t = _largest_divisor_tile(HW, 1024)
    if t == 0:
        t = HW
    return pl.pallas_call(
        _se_scale_kernel,
        out_shape=jax.ShapeDtypeStruct((N, HW, C), jnp.bfloat16),
        grid=(N, HW // t),
        in_specs=[
            pl.BlockSpec((1, t, C), lambda i, j: (i, j, 0)),
            pl.BlockSpec((1, 1, C), lambda i, j: (i, 0, 0)),
            pl.BlockSpec((1, t, C), lambda i, j: (i, j, 0)),
        ],
        out_specs=pl.BlockSpec((1, t, C), lambda i, j: (i, j, 0)),
        compiler_params=pltpu.CompilerParams(
            dimension_semantics=("parallel", "parallel")),
    )(x, gate, resid)


# ------------------------- fused tail: AvgPool2d(7) + last_linear -------------------------

def _tail_kernel(x_ref, w_ref, b_ref, o_ref, *, inv_hw):
    pooled = jnp.sum(x_ref[...].astype(jnp.float32), axis=1) * inv_hw        # (N, C) f32
    y = jnp.dot(pooled.astype(jnp.bfloat16), w_ref[...],
                preferred_element_type=jnp.float32) + b_ref[...]
    o_ref[...] = y


def avgpool_fc(x, w, b):
    """x: (N, HW, C) bf16; w: (C, num_classes); b: (num_classes,). Single fused kernel."""
    N, HW, C = x.shape
    NC = w.shape[1]
    return pl.pallas_call(
        functools.partial(_tail_kernel, inv_hw=1.0 / HW),
        out_shape=jax.ShapeDtypeStruct((N, NC), jnp.float32),
        grid=(1,),
        in_specs=[
            pl.BlockSpec((N, HW, C), lambda i: (0, 0, 0)),
            pl.BlockSpec((C, NC), lambda i: (0, 0)),
            pl.BlockSpec((1, NC), lambda i: (0, 0)),
        ],
        out_specs=pl.BlockSpec((N, NC), lambda i: (0, 0)),
    )(x.astype(jnp.bfloat16), w.astype(jnp.bfloat16),
      b.reshape(1, NC).astype(jnp.float32))


# ------------------------- pooling -------------------------

def maxpool_3x3_s2_ceil(x):
    """MaxPool2d(kernel=3, stride=2, ceil_mode=True), NHWC, bf16.
    TODO(synk): overlapping stride-2 pooling windows have no clean BlockSpec mapping;
    the 9-tap running max is left to XLA (fuses into one pass over the input)."""
    N, H, W, C = x.shape
    OH = -(-(H - 3) // 2) + 1
    OW = -(-(W - 3) // 2) + 1
    Hp = 2 * (OH - 1) + 3
    Wp = 2 * (OW - 1) + 3
    xpad = jnp.pad(x, ((0, 0), (0, Hp - H), (0, Wp - W), (0, 0)),
                   constant_values=-jnp.inf)
    m = None
    for kh in range(3):
        for kw in range(3):
            tap = xpad[:, kh:kh + 2 * (OH - 1) + 1:2,
                       kw:kw + 2 * (OW - 1) + 1:2, :]
            m = tap if m is None else jnp.maximum(m, tap)
    return m


# ------------------------- conv dispatcher -------------------------

def conv2d_bn_act(x, w, scale, bias, stride, pad, act):
    """x: (N,H,W,Cin) NHWC bf16. w: PyTorch layout (Cout,Cin,KH,KW). Fused BN + act.
    `stride`/`pad` are static Python ints."""
    N, H, W, Cin = x.shape
    Cout, _, KH, KW = w.shape

    if KH == 3 and KW == 3 and stride == 1 and pad == 1:
        return conv3x3_s1_bn_act(x, w, scale, bias, act=act)

    OH = (H + 2 * pad - KH) // stride + 1
    OW = (W + 2 * pad - KW) // stride + 1
    xb = x.astype(jnp.bfloat16)
    wb = w.astype(jnp.bfloat16)

    if KH == 1 and KW == 1 and pad == 0:
        patches = xb[:, ::stride, ::stride, :].reshape(N * OH * OW, Cin)
        wmat = wb.reshape(Cout, Cin).T
    else:
        # general im2col path (only the 7x7/stride-2 stem conv; Cin=3 there so the patch
        # tensor stays small).  K is padded to 128 inside the single concat (no extra pass).
        # TODO(synk): a fused stride-2 windowed conv has no clean BlockSpec mapping.
        K = KH * KW * Cin
        Kp = _round_up(K, 128)
        xpad = jnp.pad(xb, ((0, 0), (pad, pad), (pad, pad), (0, 0)))
        cols = []
        for kh in range(KH):
            for kw in range(KW):
                cols.append(xpad[:, kh:kh + stride * (OH - 1) + 1:stride,
                                 kw:kw + stride * (OW - 1) + 1:stride, :])
        if Kp != K:
            cols.append(jnp.zeros((N, OH, OW, Kp - K), jnp.bfloat16))
        patches = jnp.concatenate(cols, axis=-1).reshape(N * OH * OW, Kp)
        wmat = jnp.transpose(wb, (2, 3, 1, 0)).reshape(K, Cout)
        if Kp != K:
            wmat = jnp.pad(wmat, ((0, Kp - K), (0, 0)))

    y = matmul_bn_act(patches, wmat, scale, bias, act=act)
    return y.reshape(N, OH, OW, Cout)


# ------------------------- SE-ResNet bottleneck + model -------------------------

def se_bottleneck(x, bp, stride):
    out = conv2d_bn_act(x, bp["conv1_w"], bp["bn1_s"], bp["bn1_b"],
                        stride=stride, pad=0, act="relu")
    out = conv2d_bn_act(out, bp["conv2_w"], bp["bn2_s"], bp["bn2_b"],
                        stride=1, pad=1, act="relu")
    out = conv2d_bn_act(out, bp["conv3_w"], bp["bn3_s"], bp["bn3_b"],
                        stride=1, pad=0, act="none")
    if "down_w" in bp:
        residual = conv2d_bn_act(x, bp["down_w"], bp["dbn_s"], bp["dbn_b"],
                                 stride=stride, pad=0, act="none")
    else:
        residual = x

    N, H, W, C = out.shape
    xf = out.reshape(N, H * W, C)
    cmid = bp["fc1_b"].shape[0]
    w1 = bp["fc1_w"].reshape(cmid, C).T                     # (C, Cmid)
    w2 = bp["fc2_w"].reshape(C, cmid).T                     # (Cmid, C)
    gate = se_gate(xf, w1, bp["fc1_b"].reshape(1, cmid),
                   w2, bp["fc2_b"].reshape(1, C))
    y = se_scale_add_relu(xf, gate, residual.reshape(N, H * W, C))
    return y.reshape(N, H, W, C)


def senet_forward(x_nchw, params):
    x = jnp.transpose(x_nchw, (0, 2, 3, 1)).astype(jnp.bfloat16)   # NCHW -> NHWC, bf16
    p0 = params["layer0"]
    x = conv2d_bn_act(x, p0["conv1_w"], p0["bn1_s"], p0["bn1_b"],
                      stride=2, pad=3, act="relu")                 # 7x7 / s2
    x = maxpool_3x3_s2_ceil(x)
    for li, lname in enumerate(("layer1", "layer2", "layer3", "layer4")):
        for bi, bp in enumerate(params[lname]):
            stride = 2 if (li > 0 and bi == 0) else 1              # static stage layout
            x = se_bottleneck(x, bp, stride)
    N, H, W, C = x.shape
    assert H == 7 and W == 7, "AvgPool2d(7, stride=1) expects a 7x7 feature map"
    # dropout_p=None (SE-ResNet config) -> no dropout
    w, b = params["last_linear"]
    return avgpool_fc(x.reshape(N, H * W, C), w.T, b)


# ------------------------- pure-JAX reference for the fused 3x3 kernel -------------------------

def _conv3x3_ref(x, w, scale, bias):
    xf = x.astype(jnp.float32)
    wf = w.astype(jnp.bfloat16).astype(jnp.float32)
    N, H, W, Cin = xf.shape
    xp = jnp.pad(xf, ((0, 0), (1, 1), (1, 1), (0, 0)))
    out = jnp.zeros((N, H, W, wf.shape[0]), jnp.float32)
    for kh in range(3):
        for kw in range(3):
            out += jnp.einsum("nhwc,oc->nhwo",
                              xp[:, kh:kh + H, kw:kw + W, :], wf[:, :, kh, kw])
    return jnp.maximum(out * scale + bias, 0.0)


# ------------------------- deterministic parameter init -------------------------

class _PInit:
    def __init__(self, key):
        self.key = key
        self.i = 0

    def _next(self):
        self.i += 1
        return jax.random.fold_in(self.key, self.i)

    def conv(self, cout, cin, kh, kw):
        fan_in = cin * kh * kw
        return (jax.random.normal(self._next(), (cout, cin, kh, kw), jnp.float32)
                * (1.0 / math.sqrt(fan_in)))

    def bn(self, c, eps=1e-5):
        gamma = 1.0 + 0.1 * jax.random.normal(self._next(), (c,), jnp.float32)
        beta = 0.1 * jax.random.normal(self._next(), (c,), jnp.float32)
        mean = 0.1 * jax.random.normal(self._next(), (c,), jnp.float32)
        var = 1.0 + 0.1 * jnp.abs(jax.random.normal(self._next(), (c,), jnp.float32))
        scale = gamma / jnp.sqrt(var + eps)
        bias = beta - mean * scale
        return scale, bias

    def vec(self, n):
        return 0.01 * jax.random.normal(self._next(), (n,), jnp.float32)

    def linear(self, in_f, out_f):
        w = jax.random.normal(self._next(), (out_f, in_f), jnp.float32) / math.sqrt(in_f)
        b = 0.01 * jax.random.normal(self._next(), (out_f,), jnp.float32)
        return w, b


def make_params(key, layers=(1, 1, 1, 1), in_ch=3, inplanes=64,
                num_classes=10, reduction=16):
    """Only arrays go into the params pytree; strides/architecture stay static in the forward."""
    pi = _PInit(key)
    expansion = 4
    params = {"layer0": {"conv1_w": pi.conv(inplanes, in_ch, 7, 7)}}
    s, b = pi.bn(inplanes)
    params["layer0"]["bn1_s"], params["layer0"]["bn1_b"] = s, b

    cur = inplanes
    for li, (planes, nblocks) in enumerate(zip((64, 128, 256, 512), layers)):
        stage_stride = 1 if li == 0 else 2
        blocks = []
        for bi in range(nblocks):
            bstride = stage_stride if bi == 0 else 1
            bp = {}
            bp["conv1_w"] = pi.conv(planes, cur, 1, 1)
            bp["bn1_s"], bp["bn1_b"] = pi.bn(planes)
            bp["conv2_w"] = pi.conv(planes, planes, 3, 3)
            bp["bn2_s"], bp["bn2_b"] = pi.bn(planes)
            bp["conv3_w"] = pi.conv(planes * expansion, planes, 1, 1)
            bp["bn3_s"], bp["bn3_b"] = pi.bn(planes * expansion)
            cmid = planes * expansion // reduction
            bp["fc1_w"] = pi.conv(cmid, planes * expansion, 1, 1)
            bp["fc1_b"] = pi.vec(cmid)
            bp["fc2_w"] = pi.conv(planes * expansion, cmid, 1, 1)
            bp["fc2_b"] = pi.vec(planes * expansion)
            if bi == 0 and (bstride != 1 or cur != planes * expansion):
                bp["down_w"] = pi.conv(planes * expansion, cur, 1, 1)  # SE-ResNet: k=1, pad=0
                bp["dbn_s"], bp["dbn_b"] = pi.bn(planes * expansion)
            blocks.append(bp)
            cur = planes * expansion
        params[f"layer{li + 1}"] = blocks

    params["last_linear"] = pi.linear(512 * expansion, num_classes)
    return params


# ------------------------- main -------------------------

if __name__ == "__main__":
    key = jax.random.PRNGKey(0)
    k_in, k_par, k_t1, k_t2 = jax.random.split(key, 4)

    # Quick correctness self-check of the fused 3x3 conv kernel (flattened-row tap trick).
    xt = jax.random.normal(k_t1, (1, 8, 12, 32), jnp.float32).astype(jnp.bfloat16)
    wt = 0.1 * jax.random.normal(k_t2, (48, 32, 3, 3), jnp.float32)
    st = jnp.ones((48,), jnp.float32)
    bt = 0.1 * jnp.ones((48,), jnp.float32)
    y_k = conv3x3_s1_bn_act(xt, wt, st, bt, act="relu").astype(jnp.float32)
    y_r = _conv3x3_ref(xt, wt, st, bt)
    max_err = float(jnp.max(jnp.abs(y_k - y_r)))
    assert max_err < 0.1 * (float(jnp.max(jnp.abs(y_r))) + 1.0), max_err

    # 224x224 input is what AvgPool2d(7) after five stride-2 stages implies.
    x = jax.random.normal(k_in, (2, 3, 224, 224), jnp.float32)
    params = make_params(k_par, layers=(1, 1, 1, 1), in_ch=3,
                         inplanes=64, num_classes=10, reduction=16)

    fwd = jax.jit(senet_forward)
    logits = fwd(x, params)
    jax.block_until_ready(logits)
    assert logits.shape == (2, 10)
    assert bool(jnp.all(jnp.isfinite(logits)))
    print("KERNEL_OK")
</pallas_src>

<mosaic_0001>
module attributes {stable_mosaic.version = 11 : i64} {
  func.func @_conv3x3_kernel(%arg0: i32, %arg1: i32, %arg2: memref<1x154x32xbf16, #tpu.memory_space<vmem>>, %arg3: memref<9x32x48xbf16, #tpu.memory_space<vmem>>, %arg4: memref<1x48xf32, #tpu.memory_space<vmem>>, %arg5: memref<1x48xf32, #tpu.memory_space<vmem>>, %arg6: memref<1x112x48xbf16, #tpu.memory_space<vmem>>) attributes {dimension_semantics = [#tpu.dimension_semantics<parallel>, #tpu.dimension_semantics<parallel>], iteration_bounds = array<i64: 1, 1>, scalar_prefetch = 0 : i64, scratch_operands = 0 : i64, tpu.core_type = #tpu.core_type<tc>, window_params = [{transform_indices = @transform_0, window_bounds = array<i64: 1, 154, 32>}, {transform_indices = @transform_1, window_bounds = array<i64: 9, 32, 48>}, {transform_indices = @transform_2, window_bounds = array<i64: 1, 48>}, {transform_indices = @transform_3, window_bounds = array<i64: 1, 48>}, {transform_indices = @transform_4, window_bounds = array<i64: 1, 112, 48>}]} {
    %cst = arith.constant 0.000000e+00 : f32
    %0 = vector.broadcast %cst : f32 to vector<112x48xf32>
    %c0 = arith.constant 0 : index
    %c0_0 = arith.constant 0 : index
    %c0_1 = arith.constant 0 : index
    %1 = vector.load %arg2[%c0, %c0_0, %c0_1] : memref<1x154x32xbf16, #tpu.memory_space<vmem>>, vector<1x112x32xbf16>
    %2 = vector.shape_cast %1 : vector<1x112x32xbf16> to vector<112x32xbf16>
    %c0_2 = arith.constant 0 : index
    %c0_3 = arith.constant 0 : index
    %c0_4 = arith.constant 0 : index
    %3 = vector.load %arg3[%c0_2, %c0_3, %c0_4] : memref<9x32x48xbf16, #tpu.memory_space<vmem>>, vector<1x32x48xbf16>
    %4 = vector.shape_cast %3 : vector<1x32x48xbf16> to vector<32x48xbf16>
    %cst_5 = arith.constant dense<0.000000e+00> : vector<112x48xf32>
    %5 = tpu.matmul %2, %4, %cst_5 {dimension_numbers = #tpu.dot_dimension_numbers<[1], [0], [0], [1], [0, 0, 1, 1], [], []>} : vector<112x32xbf16>, vector<32x48xbf16>, vector<112x48xf32> -> vector<112x48xf32>
    %6 = arith.addf %0, %5 : vector<112x48xf32>
    %c0_6 = arith.constant 0 : index
    %c1 = arith.constant 1 : index
    %c0_7 = arith.constant 0 : index
    %7 = vector.load %arg2[%c0_6, %c1, %c0_7] : memref<1x154x32xbf16, #tpu.memory_space<vmem>>, vector<1x112x32xbf16>
    %8 = vector.shape_cast %7 : vector<1x112x32xbf16> to vector<112x32xbf16>
    %c1_8 = arith.constant 1 : index
    %c0_9 = arith.constant 0 : index
    %c0_10 = arith.constant 0 : index
    %9 = vector.load %arg3[%c1_8, %c0_9, %c0_10] : memref<9x32x48xbf16, #tpu.memory_space<vmem>>, vector<1x32x48xbf16>
    %10 = vector.shape_cast %9 : vector<1x32x48xbf16> to vector<32x48xbf16>
    %cst_11 = arith.constant dense<0.000000e+00> : vector<112x48xf32>
    %11 = tpu.matmul %8, %10, %cst_11 {dimension_numbers = #tpu.dot_dimension_numbers<[1], [0], [0], [1], [0, 0, 1, 1], [], []>} : vector<112x32xbf16>, vector<32x48xbf16>, vector<112x48xf32> -> vector<112x48xf32>
    %12 = arith.addf %6, %11 : vector<112x48xf32>
    %c0_12 = arith.constant 0 : index
    %c2 = arith.constant 2 : index
    %c0_13 = arith.constant 0 : index
    %13 = vector.load %arg2[%c0_12, %c2, %c0_13] : memref<1x154x32xbf16, #tpu.memory_space<vmem>>, vector<1x112x32xbf16>
    %14 = vector.shape_cast %13 : vector<1x112x32xbf16> to vector<112x32xbf16>
    %c2_14 = arith.constant 2 : index
    %c0_15 = arith.constant 0 : index
    %c0_16 = arith.constant 0 : index
    %15 = vector.load %arg3[%c2_14, %c0_15, %c0_16] : memref<9x32x48xbf16, #tpu.memory_space<vmem>>, vector<1x32x48xbf16>
    %16 = vector.shape_cast %15 : vector<1x32x48xbf16> to vector<32x48xbf16>
    %cst_17 = arith.constant dense<0.000000e+00> : vector<112x48xf32>
    %17 = tpu.matmul %14, %16, %cst_17 {dimension_numbers = #tpu.dot_dimension_numbers<[1], [0], [0], [1], [0, 0, 1, 1], [], []>} : vector<112x32xbf16>, vector<32x48xbf16>, vector<112x48xf32> -> vector<112x48xf32>
    %18 = arith.addf %12, %17 : vector<112x48xf32>
    %c0_18 = arith.constant 0 : index
    %c14 = arith.constant 14 : index
    %c0_19 = arith.constant 0 : index
    %19 = vector.load %arg2[%c0_18, %c14, %c0_19] : memref<1x154x32xbf16, #tpu.memory_space<vmem>>, vector<1x112x32xbf16>
    %20 = vector.shape_cast %19 : vector<1x112x32xbf16> to vector<112x32xbf16>
    %c3 = arith.constant 3 : index
    %c0_20 = arith.constant 0 : index
    %c0_21 = arith.constant 0 : index
    %21 = vector.load %arg3[%c3, %c0_20, %c0_21] : memref<9x32x48xbf16, #tpu.memory_space<vmem>>, vector<1x32x48xbf16>
    %22 = vector.shape_cast %21 : vector<1x32x48xbf16> to vector<32x48xbf16>
    %cst_22 = arith.constant dense<0.000000e+00> : vector<112x48xf32>
    %23 = tpu.matmul %20, %22, %cst_22 {dimension_numbers = #tpu.dot_dimension_numbers<[1], [0], [0], [1], [0, 0, 1, 1], [], []>} : vector<112x32xbf16>, vector<32x48xbf16>, vector<112x48xf32> -> vector<112x48xf32>
    %24 = arith.addf %18, %23 : vector<112x48xf32>
    %c0_23 = arith.constant 0 : index
    %c15 = arith.constant 15 : index
    %c0_24 = arith.constant 0 : index
    %25 = vector.load %arg2[%c0_23, %c15, %c0_24] : memref<1x154x32xbf16, #tpu.memory_space<vmem>>, vector<1x112x32xbf16>
    %26 = vector.shape_cast %25 : vector<1x112x32xbf16> to vector<112x32xbf16>
    %c4 = arith.constant 4 : index
    %c0_25 = arith.constant 0 : index
    %c0_26 = arith.constant 0 : index
    %27 = vector.load %arg3[%c4, %c0_25, %c0_26] : memref<9x32x48xbf16, #tpu.memory_space<vmem>>, vector<1x32x48xbf16>
    %28 = vector.shape_cast %27 : vector<1x32x48xbf16> to vector<32x48xbf16>
    %cst_27 = arith.constant dense<0.000000e+00> : vector<112x48xf32>
    %29 = tpu.matmul %26, %28, %cst_27 {dimension_numbers = #tpu.dot_dimension_numbers<[1], [0], [0], [1], [0, 0, 1, 1], [], []>} : vector<112x32xbf16>, vector<32x48xbf16>, vector<112x48xf32> -> vector<112x48xf32>
    %30 = arith.addf %24, %29 : vector<112x48xf32>
    %c0_28 = arith.constant 0 : index
    %c16 = arith.constant 16 : index
    %c0_29 = arith.constant 0 : index
    %31 = vector.load %arg2[%c0_28, %c16, %c0_29] : memref<1x154x32xbf16, #tpu.memory_space<vmem>>, vector<1x112x32xbf16>
    %32 = vector.shape_cast %31 : vector<1x112x32xbf16> to vector<112x32xbf16>
    %c5 = arith.constant 5 : index
    %c0_30 = arith.constant 0 : index
    %c0_31 = arith.constant 0 : index
    %33 = vector.load %arg3[%c5, %c0_30, %c0_31] : memref<9x32x48xbf16, #tpu.memory_space<vmem>>, vector<1x32x48xbf16>
    %34 = vector.shape_cast %33 : vector<1x32x48xbf16> to vector<32x48xbf16>
    %cst_32 = arith.constant dense<0.000000e+00> : vector<112x48xf32>
    %35 = tpu.matmul %32, %34, %cst_32 {dimension_numbers = #tpu.dot_dimension_numbers<[1], [0], [0], [1], [0, 0, 1, 1], [], []>} : vector<112x32xbf16>, vector<32x48xbf16>, vector<112x48xf32> -> vector<112x48xf32>
    %36 = arith.addf %30, %35 : vector<112x48xf32>
    %c0_33 = arith.constant 0 : index
    %c28 = arith.constant 28 : index
    %c0_34 = arith.constant 0 : index
    %37 = vector.load %arg2[%c0_33, %c28, %c0_34] : memref<1x154x32xbf16, #tpu.memory_space<vmem>>, vector<1x112x32xbf16>
    %38 = vector.shape_cast %37 : vector<1x112x32xbf16> to vector<112x32xbf16>
    %c6 = arith.constant 6 : index
    %c0_35 = arith.constant 0 : index
    %c0_36 = arith.constant 0 : index
    %39 = vector.load %arg3[%c6, %c0_35, %c0_36] : memref<9x32x48xbf16, #tpu.memory_space<vmem>>, vector<1x32x48xbf16>
    %40 = vector.shape_cast %39 : vector<1x32x48xbf16> to vector<32x48xbf16>
    %cst_37 = arith.constant dense<0.000000e+00> : vector<112x48xf32>
    %41 = tpu.matmul %38, %40, %cst_37 {dimension_numbers = #tpu.dot_dimension_numbers<[1], [0], [0], [1], [0, 0, 1, 1], [], []>} : vector<112x32xbf16>, vector<32x48xbf16>, vector<112x48xf32> -> vector<112x48xf32>
    %42 = arith.addf %36, %41 : vector<112x48xf32>
    %c0_38 = arith.constant 0 : index
    %c29 = arith.constant 29 : index
    %c0_39 = arith.constant 0 : index
    %43 = vector.load %arg2[%c0_38, %c29, %c0_39] : memref<1x154x32xbf16, #tpu.memory_space<vmem>>, vector<1x112x32xbf16>
    %44 = vector.shape_cast %43 : vector<1x112x32xbf16> to vector<112x32xbf16>
    %c7 = arith.constant 7 : index
    %c0_40 = arith.constant 0 : index
    %c0_41 = arith.constant 0 : index
    %45 = vector.load %arg3[%c7, %c0_40, %c0_41] : memref<9x32x48xbf16, #tpu.memory_space<vmem>>, vector<1x32x48xbf16>
    %46 = vector.shape_cast %45 : vector<1x32x48xbf16> to vector<32x48xbf16>
    %cst_42 = arith.constant dense<0.000000e+00> : vector<112x48xf32>
    %47 = tpu.matmul %44, %46, %cst_42 {dimension_numbers = #tpu.dot_dimension_numbers<[1], [0], [0], [1], [0, 0, 1, 1], [], []>} : vector<112x32xbf16>, vector<32x48xbf16>, vector<112x48xf32> -> vector<112x48xf32>
    %48 = arith.addf %42, %47 : vector<112x48xf32>
    %c0_43 = arith.constant 0 : index
    %c30 = arith.constant 30 : index
    %c0_44 = arith.constant 0 : index
    %49 = vector.load %arg2[%c0_43, %c30, %c0_44] : memref<1x154x32xbf16, #tpu.memory_space<vmem>>, vector<1x112x32xbf16>
    %50 = vector.shape_cast %49 : vector<1x112x32xbf16> to vector<112x32xbf16>
    %c8 = arith.constant 8 : index
    %c0_45 = arith.constant 0 : index
    %c0_46 = arith.constant 0 : index
    %51 = vector.load %arg3[%c8, %c0_45, %c0_46] : memref<9x32x48xbf16, #tpu.memory_space<vmem>>, vector<1x32x48xbf16>
    %52 = vector.shape_cast %51 : vector<1x32x48xbf16> to vector<32x48xbf16>
    %cst_47 = arith.constant dense<0.000000e+00> : vector<112x48xf32>
    %53 = tpu.matmul %50, %52, %cst_47 {dimension_numbers = #tpu.dot_dimension_numbers<[1], [0], [0], [1], [0, 0, 1, 1], [], []>} : vector<112x32xbf16>, vector<32x48xbf16>, vector<112x48xf32> -> vector<112x48xf32>
    %54 = arith.addf %48, %53 : vector<112x48xf32>
    %c0_48 = arith.constant 0 : index
    %c0_49 = arith.constant 0 : index
    %55 = vector.load %arg4[%c0_48, %c0_49] : memref<1x48xf32, #tpu.memory_space<vmem>>, vector<1x48xf32>
    %56 = vector.broadcast %55 : vector<1x48xf32> to vector<112x48xf32>
    %57 = arith.mulf %54, %56 : vector<112x48xf32>
    %c0_50 = arith.constant 0 : index
    %c0_51 = arith.constant 0 : index
    %58 = vector.load %arg5[%c0_50, %c0_51] : memref<1x48xf32, #tpu.memory_space<vmem>>, vector<1x48xf32>
    %59 = vector.broadcast %58 : vector<1x48xf32> to vector<112x48xf32>
    %60 = arith.addf %57, %59 : vector<112x48xf32>
    %cst_52 = arith.constant 0.000000e+00 : f32
    %61 = vector.broadcast %cst_52 : f32 to vector<112x48xf32>
    %62 = arith.maximumf %60, %61 : vector<112x48xf32>
    %63 = arith.truncf %62 : vector<112x48xf32> to vector<112x48xbf16>
    %c0_53 = arith.constant 0 : index
    %c0_54 = arith.constant 0 : index
    %c0_55 = arith.constant 0 : index
    %64 = vector.load %arg6[%c0_53, %c0_54, %c0_55] : memref<1x112x48xbf16, #tpu.memory_space<vmem>>, vector<1x112x48xbf16>
    %65 = vector.shape_cast %64 : vector<1x112x48xbf16> to vector<112x48xbf16>
    %66 = vector.shape_cast %63 : vector<112x48xbf16> to vector<1x112x48xbf16>
    tpu.vector_store %arg6[%c0_53, %c0_54, %c0_55], %66 {strides = array<i32>} : memref<1x112x48xbf16, #tpu.memory_space<vmem>>, vector<1x112x48xbf16>,
    return
  }
  func.func @transform_0(%arg0: i32, %arg1: i32) -> (i32, i32, i32) {
    %c0_i32 = arith.constant 0 : i32
    %c0_i32_0 = arith.constant 0 : i32
    %c0_i32_1 = arith.constant 0 : i32
    return %arg0, %c0_i32, %c0_i32_0 : i32, i32, i32
  }
  func.func @transform_1(%arg0: i32, %arg1: i32) -> (i32, i32, i32) {
    %c0_i32 = arith.constant 0 : i32
    %c0_i32_0 = arith.constant 0 : i32
    %c0_i32_1 = arith.constant 0 : i32
    return %c0_i32, %c0_i32_0, %arg1 : i32, i32, i32
  }
  func.func @transform_2(%arg0: i32, %arg1: i32) -> (i32, i32) {
    %c0_i32 = arith.constant 0 : i32
    %c0_i32_0 = arith.constant 0 : i32
    return %c0_i32, %arg1 : i32, i32
  }
  func.func @transform_3(%arg0: i32, %arg1: i32) -> (i32, i32) {
    %c0_i32 = arith.constant 0 : i32
    %c0_i32_0 = arith.constant 0 : i32
    return %c0_i32, %arg1 : i32, i32
  }
  func.func @transform_4(%arg0: i32, %arg1: i32) -> (i32, i32, i32) {
    %c0_i32 = arith.constant 0 : i32
    %c0_i32_0 = arith.constant 0 : i32
    return %arg0, %c0_i32, %arg1 : i32, i32, i32
  }
}

</mosaic_0001>

<bundles_post_ra>
// kernel: tpu_custom_call.1
= control target key start
LH: loop header
LB: loop body
LE: loop exit
PB: predicated region body
PF: predicated region fallthrough
CT: control target
= control target key end

     0   :  { %9 = vsyncpa [#allocation3], 0  ;;  %s2447_s15 = smov [#allocation2]   ;;  %s3292_s0 = inlined_call_operand.vmem [shape: bf16[1,154,32], index: 0, kind: input, shape index: {}]   ;;  %s3293_s1 = inlined_call_operand.hbm [shape: bf16[9,32,48], index: 1, kind: input, shape index: {}]   ;;  %s3294_s2 = inlined_call_operand.vmem [shape: f32[1,48], index: 2, kind: input, shape index: {}]   ;;  %s3295_s3 = inlined_call_operand.vmem [shape: f32[1,48], index: 3, kind: input, shape index: {}]   ;;  %s3296_s4 = inlined_call_operand.vmem [shape: bf16[1,112,48], index: 4, kind: output, shape index: {}]  }
   0x1   :  { %s17_s16 = sshll.u32 %s2447_s15, 4  ;;  %s18_s16 = int_to_ptr.vmem [resolvable:$true] %s17_s16 }
   0x2   :  { %s2433_s17 = scalar_lea.vmem %s18_s16, 2304  ;;  %p2438_p1 = scmp.lt.s32.totalorder %s18_s16, %s18_s16 }
   0x3   :  { %p2434_p0 = scmp.ne.s32.totalorder %s18_s16, %s2433_s17  ;;  %p2439_p2 = scmp.lt.s32.totalorder %s2433_s17, %s2433_s17 }
   0x5   :  { %p2440_p3 = por %p2439_p2, %p2438_p1 }
   0x7   :  { %p2441_p4 = pnand %p2440_p3, %p2434_p0 }
   0x9   :  { %2444 = shalt.err (!%p2441_p4)
}
   0xa   :  { %s2448_s18 = smov 64   ;;  %s2449_s19 = smov 4  }
   0xb   :  { %23 = dma.hbm_to_vmem [thread:$0]  %s3293_s1, 2304, %s18_s16, [#allocation3], %s2448_s18, %s2448_s18, %s2449_s19  }
   0xc   :  { %2445 = dma.done.wait [#allocation3], 2304  }
   0xd   :  { %2446 = vsyncadd [#allocation3], 4294964992  ;;  %v2450_v0 = vmov 0.0   ;;  %vm2451_vm0 = vmmov 0   ;;  %v2372_v1 = vld [vmem:[#allocation2 + $0x18] sm:$0xff]   ;;  %v2373_v2 = vld [vmem:[#allocation2 + $0x10] sm:$0xff]  }
   0xe   :  { %2075 = vmatprep.subr.bf16.mxu0 %v2450_v0  ;;  %2363 = vmatprep.subr.bf16.mxu1 %v2450_v0  ;;  %vm94_vm1 = vsmask.f32 7424  ;;  %v32_v3 = vld [vmem:[%s3292_s0] sm:$0xf]  ;;  %v2492_v4 = vld [vmem:[%s3292_s0 + $0x4] sm:$0xf] }
   0xf   :  { %2079 = vmatprep.mubr.msk.bf16.mxu0 %vm2451_vm0, %v2450_v0  ;;  %2095 = vmatprep.mubr.msk.bf16.mxu1 %vm2451_vm0, %v2450_v0  ;;  %v2497_v5 = vcombine.low %v32_v3, %v2492_v4  ;;  %v2502_v6 = vld [vmem:[%s3292_s0 + $0x8] sm:$0xff]   ;;  %vm167_vm2 = vcmask 261120   ;;  %v2510_v10 = vld [vmem:[%s3292_s0 + $0x20] sm:$0xff]   ;;  %v2525_v20 = vld [vmem:[%s3292_s0 + $0x10] sm:$0xff]   ;;  %vm402_vm3 = vcmask 1046528   ;;  %vm612_vm4 = vcmask 1044480  }
  0x10   :  { %2076 = vmatpush3.bf16.msra.mxu0 %v2372_v1  ;;  %2365 = vmatpush3.bf16.msra.mxu1 %v2372_v1  ;;  %v103_v9 = vshll.u32 %v2502_v6, 16  ;;  %v2515_v11 = vld [vmem:[%s3292_s0 + $0x28] sm:$0xff]   ;;  %v127_v14 = vshll.u32 %v2510_v10, 16  ;;  %v131_v15 = vshrl.u32 %v2510_v10, 16  ;;  %v107_v21 = vshrl.u32 %v2502_v6, 16  ;;  %v2531_v22 = vld [vmem:[%s3292_s0 + $0x30] sm:$0xff]  }
  0x11   :  { %2077 = vmatprep.subr.bf16.mxu0 %v2450_v0  ;;  %2364 = vmatprep.subr.bf16.mxu1 %v2450_v0  ;;  %v96_v7 = vshrl.u32 %v2497_v5, 16  ;;  %v98_v8 = vshll.u32 %v2497_v5, 16  ;;  %v135_v16 = vshll.u32 %v2515_v11, 16  ;;  %v2378_v17 = vld [vmem:[#allocation2 + $0x28] sm:$0xff]   ;;  %v111_v27 = vshll.u32 %v2525_v20, 16  ;;  %v2544_v33 = vld [vmem:[%s3292_s0 + $0x18] sm:$0xff]  }
  0x12   :  { %v105_v13 = vrot.slane %v103_v9, 1  ;;  %v129_v19 = vrot.slane %v127_v14, 1  ;;  %v2379_v24 = vld [vmem:[#allocation2 + $0x8] sm:$0xff]   ;;  %v139_v28 = vshrl.u32 %v2515_v11, 16  ;;  %v143_v29 = vshll.u32 %v2531_v22, 16  ;;  %v2384_v35 = vld [vmem:[#allocation2 + $0x20] sm:$0xff]  }
  0x13   :  { %v100_v12 = vrot.slane %v98_v8, 1  ;;  %v137_v23 = vrot.slane %v135_v16, 1  ;;  %v113_v32 = vrot.slane %v111_v27, 1  ;;  %v2550_v34 = vld [vmem:[%s3292_s0 + $0x38] ss:$0 sps:$4 sm:$0x11]  }
  0x14   :  { %2078 = vmatpush3.bf16.msra.mxu0 %v2373_v2  ;;  %2366 = vmatpush3.bf16.msra.mxu1 %v2373_v2  ;;  %v133_v26 = vor.u32 %v131_v15, %v129_v19  ;;  %v109_v31 = vor.u32 %v107_v21, %v105_v13  ;;  %v145_v37 = vrot.slane %v143_v29, 1  ;;  %v2385_v38 = vld [vmem:[#allocation2] sm:$0xff]   ;;  %v115_v40 = vshrl.u32 %v2525_v20, 16  ;;  %v2386_v56 = vld [vmem:[#allocation2 + $0x38] sm:$0xff]   ;;  %v2389_v59 = vld [vmem:[#allocation2 + $0x30] sm:$0xff]  }
  0x15   :  { %2139 = vmatprep.subr.bf16.mxu0 %v2450_v0  ;;  %2107 = vmatprep.subr.bf16.mxu1 %v2450_v0  ;;  %v101_v18 = vor.u32 %v100_v12, %v96_v7  ;;  %v141_v36 = vor.u32 %v139_v28, %v137_v23  ;;  %v119_v41 = vshll.u32 %v2544_v33, 16  ;;  %v147_v43 = vshrl.u32 %v2531_v22, 16  ;;  %v393_v53 = vld [vmem:[%s3292_s0] sm:$0xe]  ;;  %v2388_v61 = vld [vmem:[#allocation2 + $0x48] sm:$0xff]  }
  0x16   :  { %v138_v30 = vsel %vm94_vm1, %v133_v26, %v137_v23  ;;  %v114_v39 = vsel %vm94_vm1, %v109_v31, %v113_v32  ;;  %v151_v44 = vshll.u32 %v2550_v34, 16  ;;  %v117_v45 = vor.u32 %v115_v40, %v113_v32  ;;  %v2390_v63 = vld [vmem:[#allocation2 + $0x40] sm:$0xff]   ;;  %v2652_v12 = vld [vmem:[%s3292_s0 + $0xc] sm:$0xf]  ;;  %v2680_v26 = vld [vmem:[%s3292_s0 + $0x18] sm:$0xf] }
  0x17   :  { %v106_v25 = vsel %vm94_vm1, %v101_v18, %v105_v13  ;;  %2096 = vmatmul.mubr.msk.bf16.vlgmr.msra.gmra.mxu1 %vm167_vm2, %v138_v30  ;;  %v146_v42 = vsel %vm94_vm1, %v141_v36, %v145_v37  ;;  %v121_v46 = vrot.slane %v119_v41, 1  ;;  %v149_v47 = vor.u32 %v147_v43, %v145_v37  ;;  %v554_v9 = vld [vmem:[%s3292_s0 + $0x4] sm:$0x8]  ;;  %v2393_v31 = vld [vmem:[#allocation2 + $0x58] sm:$0xff]   ;;  %v2699_v40 = vld [vmem:[%s3292_s0 + $0x20] sm:$0xf] }
  0x18   :  { %2080 = vmatmul.mubr.msk.bf16.vlgmr.msra.gmra.mxu0 %vm167_vm2, %v106_v25  ;;  %2099 = vmatprep.mubr.msk.bf16.mxu1 %vm2451_vm0, %v2450_v0  ;;  %v153_v48 = vrot.slane %v151_v44, 1  ;;  %v123_v50 = vshrl.u32 %v2544_v33, 16  ;;  %v1874_v55 = vcombine.low %v393_v53, %v2492_v4  ;;  %v404_v58 = vrot.slane %v2502_v6, 1  ;;  %v2675_v25 = vld [vmem:[%s3292_s0 + $0x14] sm:$0xf] }
  0x19   :  { %2140 = vmatpush3.bf16.msra.mxu0 %v2378_v17  ;;  %2083 = vmatprep.mubr.msk.bf16.mxu0 %vm2451_vm0, %v2450_v0  ;;  %v122_v49 = vsel %vm94_vm1, %v117_v45, %v121_v46  ;;  %v406_v62 = vrot.slane %v2525_v20, 1  ;;  %v408_v2 = vrot.slane %v2544_v33, 1  ;;  %v410_v4 = vrot.slane %v2510_v10, 1  ;;  %v2722_v53 = vld [vmem:[%s3292_s0 + $0x28] sm:$0xf] }
  0x1a   :  { %2141 = vmatprep.subr.bf16.mxu0 %v2450_v0  ;;  %2108 = vmatpush3.bf16.msra.mxu1 %v2379_v24  ;;  %v154_v51 = vsel %vm94_vm1, %v149_v47, %v153_v48  ;;  %v125_v52 = vor.u32 %v123_v50, %v121_v46  ;;  %v403_v57 = vrot.slane %v1874_v55, 1  ;;  %v414_v8 = vrot.slane %v2531_v22, 1  ;;  %v2400_v50 = vld [vmem:[#allocation2 + $0x60] sm:$0xff]  }
  0x1b   :  { %2109 = vmatprep.subr.bf16.mxu1 %v2450_v0  ;;  %v407_v1 = vsel %vm402_vm3, %v404_v58, %v406_v62  ;;  %v409_v3 = vsel %vm402_vm3, %v406_v62, %v408_v2  ;;  %v416_v16 = vrot.slane %v2550_v34, 1  ;;  %v1886_v32 = vcombine.low %v2675_v25, %v2680_v26 }
  0x1c   :  { %v130_v54 = vsel %vm94_vm1, %v125_v52, %v129_v19  ;;  %v405_v60 = vsel %vm402_vm3, %v403_v57, %v404_v58  ;;  %vm773_vm5 = vsmask.f32 4352  ;;  %v2717_v52 = vld [vmem:[%s3292_s0 + $0x24] sm:$0xf]  ;;  %vm1187_vm6 = vcmask 1045504  }
  0x1d   :  { %2142 = vmatpush3.bf16.msra.mxu0 %v2384_v35  ;;  %v417_v24 = vsel %vm402_vm3, %v414_v8, %v416_v16  ;;  %v792_v35 = vshrl.u32 %v1886_v32, 16  ;;  %v795_v36 = vshll.u32 %v1886_v32, 16  ;;  %v616_v37 = vrot.slane %v1886_v32, 3 }
  0x1e   :  { %2203 = vmatprep.subr.bf16.mxu0 %v2450_v0  ;;  %2110 = vmatpush3.bf16.msra.mxu1 %v2385_v38  ;;  %v2399_v38 = vld [vmem:[#allocation2 + $0x50] sm:$0xff]   ;;  %v1888_v58 = vcombine.low %v2717_v52, %v2722_v53  ;;  %vm1348_vm7 = vsmask.f32 5376  ;;  %vm1828_vm8 = vcmask 388096  }
  0x1f   :  { %2171 = vmatprep.subr.bf16.mxu1 %v2450_v0  ;;  %2100 = vmatmul.mubr.msk.bf16.gmra.mxu1 %vm167_vm2, %v146_v42  ;;  %v2395_v42 = vld [vmem:[#allocation2 + $0x68] sm:$0xff]   ;;  %v794_v43 = vrot.slane %v792_v35, 3  ;;  %v797_v44 = vrot.slane %v795_v36, 4 }
  0x20   :  { %2084 = vmatmul.mubr.msk.bf16.gmra.mxu0 %vm167_vm2, %v114_v39  ;;  %2103 = vmatprep.mubr.msk.bf16.mxu1 %vm2451_vm0, %v2450_v0  ;;  %v2694_v39 = vld [vmem:[%s3292_s0 + $0x1c] sm:$0xf]  ;;  %v620_v62 = vrot.slane %v1888_v58, 3 }
  0x21   :  { %2087 = vmatprep.mubr.msk.bf16.mxu0 %vm2451_vm0, %v2450_v0  ;;  %v1887_v46 = vcombine.low %v2694_v39, %v2699_v40  ;;  %v798_v47 = vor.u32 %v797_v44, %v794_v43 }
  0x23   :  { %v801_v48 = vshrl.u32 %v1887_v46, 16 }
  0x25   :  { %v803_v55 = vrot.slane %v801_v48, 3 }
  0x27   :  { %2104 = vmatmul.mubr.msk.bf16.gmra.mxu1 %vm167_vm2, %v154_v51  ;;  %v618_v51 = vrot.slane %v1887_v46, 3 }
  0x28   :  { %2088 = vmatmul.mubr.msk.bf16.gmra.mxu0 %vm167_vm2, %v122_v49  ;;  %2111 = vmatprep.mubr.msk.bf16.mxu1 %vm2451_vm0, %v2450_v0  ;;  %v804_v49 = vshll.u32 %v1887_v46, 16  ;;  %v2805_v46 = vld [vmem:[%s3292_s0 + $0x10] sm:$0xf] }
  0x29   :  { %2091 = vmatprep.mubr.msk.bf16.mxu0 %vm2451_vm0, %v2450_v0  ;;  %v619_v57 = vsel %vm612_vm4, %v616_v37, %v618_v51 }
  0x2f   :  { %2112 = vmatmul.mubr.msk.bf16.vlgmr.msra.gmra.mxu1 %vm167_vm2, %v2497_v5  ;;  %v411_v5 = vsel %vm402_vm3, %v408_v2, %v410_v4 }
  0x30   :  { %2092 = vmatmul.mubr.msk.bf16.gmra.mxu0 %vm167_vm2, %v130_v54  ;;  %2115 = vmatprep.mubr.msk.bf16.mxu1 %vm2451_vm0, %v2450_v0 }
  0x31   :  { %2143 = vmatprep.mubr.msk.bf16.mxu0 %vm2451_vm0, %v2450_v0  ;;  %2172 = vmatpush3.bf16.msra.mxu1 %v2386_v56  ;;  %v806_v56 = vrot.slane %v804_v49, 4  ;;  %v2816_v49 = vld [vmem:[%s3292_s0 + $0x14] sm:$0xff]  }
  0x32   :  { %2173 = vmatprep.subr.bf16.mxu1 %v2450_v0 }
  0x35   :  { %2174 = vmatpush3.bf16.msra.mxu1 %v2389_v59  ;;  %v807_v59 = vor.u32 %v806_v56, %v803_v55  ;;  %v1189_v55 = vrot.slane %v2816_v49, 2  ;;  %v2416_v56 = vld [vmem:[#allocation2 + $0x70] sm:$0xff]  }
  0x36   :  { %2235 = vmatprep.subr.bf16.mxu1 %v2450_v0 }
  0x37   :  { %2116 = vmatmul.mubr.msk.bf16.gmra.mxu1 %vm167_vm2, %v2502_v6  ;;  %v412_v6 = vrot.slane %v2515_v11, 1  ;;  %v808_v2 = vsel %vm773_vm5, %v798_v47, %v807_v59 }
  0x38   :  { %2144 = vmatmul.mubr.msk.bf16.vlgmr.msra.gmra.mxu0 %vm167_vm2, %v405_v60  ;;  %2119 = vmatprep.mubr.msk.bf16.mxu1 %vm2451_vm0, %v2450_v0  ;;  %v810_v60 = vshrl.u32 %v1888_v58, 16 }
  0x39   :  { %2204 = vmatpush3.bf16.msra.mxu0 %v2388_v61  ;;  %2147 = vmatprep.mubr.msk.bf16.mxu0 %vm2451_vm0, %v2450_v0  ;;  %v413_v7 = vsel %vm402_vm3, %v410_v4, %v412_v6  ;;  %v415_v13 = vsel %vm402_vm3, %v412_v6, %v414_v8  ;;  %v813_v61 = vshll.u32 %v1888_v58, 16 }
  0x3a   :  { %2205 = vmatprep.subr.bf16.mxu0 %v2450_v0 }
  0x3b   :  { %v815_v4 = vrot.slane %v813_v61, 4 }
  0x3d   :  { %2206 = vmatpush3.bf16.msra.mxu0 %v2390_v63  ;;  %v2738_v63 = vld [vmem:[%s3292_s0 + $0x2c] sm:$0xf] }
  0x3e   :  { %2267 = vmatprep.subr.bf16.mxu0 %v2450_v0 }
  0x3f   :  { %2120 = vmatmul.mubr.msk.bf16.gmra.mxu1 %vm167_vm2, %v2525_v20 }
  0x40   :  { %2148 = vmatmul.mubr.msk.bf16.gmra.mxu0 %vm167_vm2, %v407_v1  ;;  %2123 = vmatprep.mubr.msk.bf16.mxu1 %vm2451_vm0, %v2450_v0  ;;  %v2743_v1 = vld [vmem:[%s3292_s0 + $0x30] sm:$0xf] }
  0x41   :  { %2151 = vmatprep.mubr.msk.bf16.mxu0 %vm2451_vm0, %v2450_v0  ;;  %v1889_v6 = vcombine.low %v2738_v63, %v2743_v1 }
  0x43   :  { %v819_v8 = vshrl.u32 %v1889_v6, 16 }
  0x47   :  { %2124 = vmatmul.mubr.msk.bf16.gmra.mxu1 %vm167_vm2, %v2544_v33 }
  0x48   :  { %2152 = vmatmul.mubr.msk.bf16.gmra.mxu0 %vm167_vm2, %v409_v3  ;;  %2127 = vmatprep.mubr.msk.bf16.mxu1 %vm2451_vm0, %v2450_v0  ;;  %v812_v3 = vrot.slane %v810_v60, 3  ;;  %v2417_v60 = vld [vmem:[#allocation2 + $0x80] sm:$0xff]  }
  0x49   :  { %2155 = vmatprep.mubr.msk.bf16.mxu0 %vm2451_vm0, %v2450_v0 }
  0x4f   :  { %2128 = vmatmul.mubr.msk.bf16.gmra.mxu1 %vm167_vm2, %v2510_v10  ;;  %v2647_v10 = vld [vmem:[%s3292_s0 + $0x8] sm:$0xf] }
  0x50   :  { %2156 = vmatmul.mubr.msk.bf16.gmra.mxu0 %vm167_vm2, %v411_v5  ;;  %2131 = vmatprep.mubr.msk.bf16.mxu1 %vm2451_vm0, %v2450_v0  ;;  %v1884_v14 = vcombine.low %v554_v9, %v2647_v10  ;;  %v621_v5 = vsel %vm612_vm4, %v618_v51, %v620_v62  ;;  %v822_v9 = vshll.u32 %v1889_v6, 16  ;;  %v2405_v51 = vld [vmem:[#allocation2 + $0x78] sm:$0xff]  }
  0x51   :  { %2159 = vmatprep.mubr.msk.bf16.mxu0 %vm2451_vm0, %v2450_v0 }
  0x52   :  { %v775_v17 = vshrl.u32 %v1884_v14, 16  ;;  %v778_v18 = vshll.u32 %v1884_v14, 16  ;;  %v613_v21 = vrot.slane %v1884_v14, 3  ;;  %v2758_v14 = vld [vmem:[%s3292_s0 + $0x34] sm:$0xf] }
  0x54   :  { %v777_v27 = vrot.slane %v775_v17, 3  ;;  %v821_v17 = vrot.slane %v819_v8, 3 }
  0x57   :  { %2132 = vmatmul.mubr.msk.bf16.gmra.mxu1 %vm167_vm2, %v2515_v11  ;;  %v2657_v11 = vld [vmem:[%s3292_s0 + $0x10] sm:$0xf] }
  0x58   :  { %2160 = vmatmul.mubr.msk.bf16.gmra.mxu0 %vm167_vm2, %v413_v7  ;;  %2135 = vmatprep.mubr.msk.bf16.mxu1 %vm2451_vm0, %v2450_v0  ;;  %v1885_v15 = vcombine.low %v2652_v12, %v2657_v11  ;;  %v816_v7 = vor.u32 %v815_v4, %v812_v3  ;;  %v1912_v58 = vcombine.low %v2657_v11, %v2675_v25  ;;  %v2849_v11 = vld [vmem:[%s3292_s0 + $0x24] sm:$0xff]   ;;  %v2864_v3 = vld [vmem:[%s3292_s0 + $0x2c] sm:$0xff]  }
  0x59   :  { %2163 = vmatprep.mubr.msk.bf16.mxu0 %vm2451_vm0, %v2450_v0  ;;  %v1913_v25 = vcombine.low %v2680_v26, %v2694_v39  ;;  %v1914_v26 = vcombine.low %v2699_v40, %v2717_v52  ;;  %v1195_v39 = vrot.slane %v2864_v3, 2  ;;  %v1915_v40 = vcombine.low %v2722_v53, %v2738_v63 }
  0x5a   :  { %v783_v19 = vshrl.u32 %v1885_v15, 16  ;;  %v786_v20 = vshll.u32 %v1885_v15, 16  ;;  %v614_v23 = vrot.slane %v1885_v15, 3  ;;  %v2763_v15 = vld [vmem:[%s3292_s0 + $0x38] sm:$0xf]  ;;  %v817_v16 = vsel %vm773_vm5, %v807_v59, %v816_v7 }
  0x5b   :  { %v1916_v53 = vcombine.low %v2743_v1, %v2758_v14  ;;  %v1361_v1 = vshll.u32 %v2816_v49, 16 }
  0x5c   :  { %v785_v28 = vrot.slane %v783_v19, 3  ;;  %v788_v29 = vrot.slane %v786_v20, 4  ;;  %v615_v30 = vsel %vm612_vm4, %v613_v21, %v614_v23  ;;  %v617_v45 = vsel %vm612_vm4, %v614_v23, %v616_v37 }
  0x5d   :  { %v1890_v20 = vcombine.low %v2758_v14, %v2763_v15 }
  0x5e   :  { %v789_v34 = vor.u32 %v788_v29, %v785_v28 }
  0x5f   :  { %2136 = vmatmul.mubr.msk.bf16.gmra.mxu1 %vm167_vm2, %v2531_v22  ;;  %v780_v22 = vrot.slane %v778_v18, 4  ;;  %v824_v18 = vrot.slane %v822_v9, 4  ;;  %v828_v23 = vshrl.u32 %v1890_v20, 16 }
  0x60   :  { %2164 = vmatmul.mubr.msk.bf16.gmra.mxu0 %vm167_vm2, %v415_v13  ;;  %2175 = vmatprep.mubr.msk.bf16.mxu1 %vm2451_vm0, %v2450_v0  ;;  %v799_v54 = vsel %vm773_vm5, %v789_v34, %v798_v47  ;;  %v622_v13 = vrot.slane %v1889_v6, 3 }
  0x61   :  { %2167 = vmatprep.mubr.msk.bf16.mxu0 %vm2451_vm0, %v2450_v0  ;;  %v781_v33 = vor.u32 %v780_v22, %v777_v27  ;;  %v825_v21 = vor.u32 %v824_v18, %v821_v17  ;;  %v2776_v27 = vld [vmem:[%s3292_s0 + $0x3c] sm:$0xf]  ;;  %v624_v22 = vrot.slane %v1890_v20, 3  ;;  %v830_v29 = vrot.slane %v828_v23, 3 }
  0x62   :  { %v623_v19 = vsel %vm612_vm4, %v620_v62, %v622_v13  ;;  %v1193_v62 = vrot.slane %v2849_v11, 2  ;;  %v1917_v17 = vcombine.low %v2763_v15, %v2776_v27 }
  0x63   :  { %v790_v41 = vsel %vm773_vm5, %v781_v33, %v789_v34  ;;  %v826_v28 = vsel %vm773_vm5, %v816_v7, %v825_v21  ;;  %v625_v32 = vsel %vm612_vm4, %v622_v13, %v624_v22  ;;  %v2402_v33 = vld [vmem:[%s3292_s0 + $0x3c] ss:$0 sps:$4 sm:$0x77]   ;;  %v1358_v13 = vshrl.u32 %v2816_v49, 16 }
  0x64   :  { %v626_v37 = vrot.slane %v2402_v33, 3  ;;  %v1196_v4 = vsel %vm1187_vm6, %v1193_v62, %v1195_v39  ;;  %v2894_v7 = vld [vmem:[%s3292_s0 + $0x3c] sm:$0xff]  }
  0x65   :  { %v1199_v63 = vrot.slane %v2894_v7, 2 }
  0x66   :  { %v627_v43 = vsel %vm612_vm4, %v624_v22, %v626_v37 }
  0x67   :  { %2176 = vmatmul.mubr.msk.bf16.vlgmr.msra.gmra.mxu1 %vm167_vm2, %v615_v30 }
  0x68   :  { %2168 = vmatmul.mubr.msk.bf16.gmra.mxu0 %vm167_vm2, %v417_v24  ;;  %2179 = vmatprep.mubr.msk.bf16.mxu1 %vm2451_vm0, %v2450_v0  ;;  %v831_v24 = vshll.u32 %v1890_v20, 16  ;;  %v1360_v20 = vrot.slane %v1358_v13, 2 }
  0x69   :  { %2207 = vmatprep.mubr.msk.bf16.mxu0 %vm2451_vm0, %v2450_v0  ;;  %2236 = vmatpush3.bf16.msra.mxu1 %v2393_v31  ;;  %v1901_v31 = vcombine.low %v2776_v27, %v2776_v27 }
  0x6a   :  { %2237 = vmatprep.subr.bf16.mxu1 %v2450_v0  ;;  %v833_v30 = vrot.slane %v831_v24, 4  ;;  %v1556_v24 = vld [vmem:[%s3292_s0 + $0xc] sm:$0x8] }
  0x6b   :  { %v837_v35 = vshrl.u32 %v1901_v31, 16  ;;  %v840_v36 = vshll.u32 %v1901_v31, 16 }
  0x6c   :  { %v834_v34 = vor.u32 %v833_v30, %v830_v29  ;;  %v1954_v30 = vcombine.low %v1556_v24, %v2805_v46  ;;  %v1572_v24 = vrot.slane %v2864_v3, 3 }
  0x6d   :  { %2238 = vmatpush3.bf16.msra.mxu1 %v2399_v38 }
  0x6e   :  { %2299 = vmatprep.subr.bf16.mxu1 %v2450_v0  ;;  %v835_v38 = vsel %vm773_vm5, %v825_v21, %v834_v34  ;;  %v1363_v21 = vrot.slane %v1361_v1, 3 }
  0x6f   :  { %2180 = vmatmul.mubr.msk.bf16.gmra.mxu1 %vm167_vm2, %v617_v45  ;;  %v1129_v45 = vld [vmem:[%s3292_s0 + $0xc] sm:$0xc] }
  0x70   :  { %2208 = vmatmul.mubr.msk.bf16.vlgmr.msra.gmra.mxu0 %vm167_vm2, %v790_v41  ;;  %2183 = vmatprep.mubr.msk.bf16.mxu1 %vm2451_vm0, %v2450_v0  ;;  %v839_v41 = vrot.slane %v837_v35, 3  ;;  %v2811_v48 = vcombine.low %v1129_v45, %v2805_v46  ;;  %v1364_v27 = vor.u32 %v1363_v21, %v1360_v20  ;;  %v1565_v35 = vrot.slane %v1954_v30, 3 }
  0x71   :  { %2268 = vmatpush3.bf16.msra.mxu0 %v2395_v42  ;;  %2211 = vmatprep.mubr.msk.bf16.mxu0 %vm2451_vm0, %v2450_v0  ;;  %v842_v42 = vrot.slane %v840_v36, 4  ;;  %v1566_v36 = vrot.slane %v2816_v49, 3  ;;  %v1406_v30 = vshll.u32 %v2894_v7, 16 }
  0x72   :  { %2269 = vmatprep.subr.bf16.mxu0 %v2450_v0  ;;  %v1350_v8 = vshrl.u32 %v2811_v48, 16  ;;  %v1353_v9 = vshll.u32 %v2811_v48, 16 }
  0x73   :  { %v843_v44 = vor.u32 %v842_v42, %v839_v41  ;;  %v1376_v42 = vshrl.u32 %v2849_v11, 16  ;;  %v1567_v46 = vsel %vm612_vm4, %v1565_v35, %v1566_v36 }
  0x74   :  { %v1352_v18 = vrot.slane %v1350_v8, 2 }
  0x75   :  { %2270 = vmatpush3.bf16.msra.mxu0 %v2400_v50  ;;  %v844_v47 = vsel %vm773_vm5, %v834_v34, %v843_v44  ;;  %v1911_v50 = vcombine.low %v2647_v10, %v2652_v12  ;;  %v2409_v12 = vld [vmem:[#allocation2 + $0x88] sm:$0xff]  }
  0x76   :  { %2331 = vmatprep.subr.bf16.mxu0 %v2450_v0 }
  0x77   :  { %2184 = vmatmul.mubr.msk.bf16.gmra.mxu1 %vm167_vm2, %v619_v57  ;;  %v2833_v57 = vld [vmem:[%s3292_s0 + $0x1c] sm:$0xff]  }
  0x78   :  { %2212 = vmatmul.mubr.msk.bf16.gmra.mxu0 %vm167_vm2, %v799_v54  ;;  %2187 = vmatprep.mubr.msk.bf16.mxu1 %vm2451_vm0, %v2450_v0  ;;  %v1188_v54 = vrot.slane %v2811_v48, 2  ;;  %v1191_v59 = vrot.slane %v2833_v57, 2  ;;  %v1367_v22 = vshrl.u32 %v2833_v57, 16 }
  0x79   :  { %2215 = vmatprep.mubr.msk.bf16.mxu0 %vm2451_vm0, %v2450_v0 }
  0x7a   :  { %v1190_v10 = vsel %vm1187_vm6, %v1188_v54, %v1189_v55  ;;  %v1192_v61 = vsel %vm1187_vm6, %v1189_v55, %v1191_v59 }
  0x7f   :  { %2188 = vmatmul.mubr.msk.bf16.gmra.mxu1 %vm167_vm2, %v621_v5  ;;  %v2879_v5 = vld [vmem:[%s3292_s0 + $0x34] sm:$0xff]  }
  0x80   :  { %2216 = vmatmul.mubr.msk.bf16.gmra.mxu0 %vm167_vm2, %v808_v2  ;;  %2191 = vmatprep.mubr.msk.bf16.mxu1 %vm2451_vm0, %v2450_v0  ;;  %v1194_v2 = vsel %vm1187_vm6, %v1191_v59, %v1193_v62  ;;  %v1197_v52 = vrot.slane %v2879_v5, 2  ;;  %v1385_v59 = vshrl.u32 %v2864_v3, 16  ;;  %v1397_v13 = vshll.u32 %v2879_v5, 16 }
  0x81   :  { %2219 = vmatprep.mubr.msk.bf16.mxu0 %vm2451_vm0, %v2450_v0 }
  0x82   :  { %v1198_v6 = vsel %vm1187_vm6, %v1195_v39, %v1197_v52  ;;  %v1200_v14 = vsel %vm1187_vm6, %v1197_v52, %v1199_v63  ;;  %v1387_v39 = vrot.slane %v1385_v59, 2  ;;  %v1399_v20 = vrot.slane %v1397_v13, 3 }
  0x87   :  { %2192 = vmatmul.mubr.msk.bf16.gmra.mxu1 %vm167_vm2, %v623_v19  ;;  %v1355_v19 = vrot.slane %v1353_v9, 3  ;;  %v1394_v9 = vshrl.u32 %v2879_v5, 16 }
  0x88   :  { %2220 = vmatmul.mubr.msk.bf16.gmra.mxu0 %vm167_vm2, %v817_v16  ;;  %2195 = vmatprep.mubr.msk.bf16.mxu1 %vm2451_vm0, %v2450_v0  ;;  %v2422_v16 = vld [vmem:[%s3292_s0 + $0x44] ss:$0 sps:$4 sm:$0x33]  }
  0x89   :  { %2223 = vmatprep.mubr.msk.bf16.mxu0 %vm2451_vm0, %v2450_v0  ;;  %v1201_v23 = vrot.slane %v2422_v16, 2  ;;  %v1356_v15 = vor.u32 %v1355_v19, %v1352_v18  ;;  %v1396_v19 = vrot.slane %v1394_v9, 2 }
  0x8b   :  { %v1202_v29 = vsel %vm1187_vm6, %v1199_v63, %v1201_v23  ;;  %v1365_v31 = vsel %vm1348_vm7, %v1356_v15, %v1364_v27 }
  0x8f   :  { %2196 = vmatmul.mubr.msk.bf16.gmra.mxu1 %vm167_vm2, %v625_v32  ;;  %v1369_v32 = vrot.slane %v1367_v22, 2 }
  0x90   :  { %2224 = vmatmul.mubr.msk.bf16.gmra.mxu0 %vm167_vm2, %v826_v28  ;;  %2199 = vmatprep.mubr.msk.bf16.mxu1 %vm2451_vm0, %v2450_v0  ;;  %v1370_v28 = vshll.u32 %v2833_v57, 16 }
  0x91   :  { %2227 = vmatprep.mubr.msk.bf16.mxu0 %vm2451_vm0, %v2450_v0 }
  0x92   :  { %v1372_v33 = vrot.slane %v1370_v28, 3  ;;  %v1400_v28 = vor.u32 %v1399_v20, %v1396_v19 }
  0x94   :  { %v1373_v41 = vor.u32 %v1372_v33, %v1369_v32 }
  0x96   :  { %v1374_v49 = vsel %vm1348_vm7, %v1364_v27, %v1373_v41 }
  0x97   :  { %2200 = vmatmul.mubr.msk.bf16.gmra.mxu1 %vm167_vm2, %v627_v43  ;;  %v1379_v43 = vshll.u32 %v2849_v11, 16 }
  0x98   :  { %2228 = vmatmul.mubr.msk.bf16.gmra.mxu0 %vm167_vm2, %v835_v38  ;;  %2239 = vmatprep.mubr.msk.bf16.mxu1 %vm2451_vm0, %v2450_v0 }
  0x99   :  { %2231 = vmatprep.mubr.msk.bf16.mxu0 %vm2451_vm0, %v2450_v0 }
  0x9f   :  { %2240 = vmatmul.mubr.msk.bf16.vlgmr.msra.gmra.mxu1 %vm167_vm2, %v1911_v50  ;;  %v1378_v50 = vrot.slane %v1376_v42, 2  ;;  %v2424_v42 = vld [vmem:[%s3292_s0 + $0x44] ss:$0 sps:$4 sm:$0x77]  }
  0xa0   :  { %2232 = vmatmul.mubr.msk.bf16.gmra.mxu0 %vm167_vm2, %v844_v47  ;;  %2243 = vmatprep.mubr.msk.bf16.mxu1 %vm2451_vm0, %v2450_v0 }
  0xa1   :  { %2271 = vmatprep.mubr.msk.bf16.mxu0 %vm2451_vm0, %v2450_v0  ;;  %2300 = vmatpush3.bf16.msra.mxu1 %v2405_v51  ;;  %v1381_v51 = vrot.slane %v1379_v43, 3 }
  0xa2   :  { %2301 = vmatprep.subr.bf16.mxu1 %v2450_v0 }
  0xa5   :  { %2302 = vmatpush3.bf16.msra.mxu1 %v2416_v56  ;;  %v1568_v56 = vrot.slane %v2833_v57, 3 }
  0xa7   :  { %2244 = vmatmul.mubr.msk.bf16.gmra.mxu1 %vm167_vm2, %v1912_v58  ;;  %v1382_v58 = vor.u32 %v1381_v51, %v1378_v50  ;;  %v1569_v62 = vsel %vm612_vm4, %v1566_v36, %v1568_v56 }
  0xa8   :  { %2272 = vmatmul.mubr.msk.bf16.vlgmr.msra.gmra.mxu0 %vm167_vm2, %v1190_v10  ;;  %2247 = vmatprep.mubr.msk.bf16.mxu1 %vm2451_vm0, %v2450_v0 }
  0xa9   :  { %2332 = vmatpush3.bf16.msra.mxu0 %v2409_v12  ;;  %2275 = vmatprep.mubr.msk.bf16.mxu0 %vm2451_vm0, %v2450_v0 }
  0xaa   :  { %2333 = vmatprep.subr.bf16.mxu0 %v2450_v0 }
  0xad   :  { %2334 = vmatpush3.bf16.msra.mxu0 %v2417_v60  ;;  %v1388_v60 = vshll.u32 %v2864_v3, 16 }
  0xaf   :  { %2248 = vmatmul.mubr.msk.bf16.gmra.mxu1 %vm167_vm2, %v1913_v25 }
  0xb0   :  { %2276 = vmatmul.mubr.msk.bf16.gmra.mxu0 %vm167_vm2, %v1192_v61  ;;  %2251 = vmatprep.mubr.msk.bf16.mxu1 %vm2451_vm0, %v2450_v0 }
  0xb1   :  { %2279 = vmatprep.mubr.msk.bf16.mxu0 %vm2451_vm0, %v2450_v0 }
  0xb7   :  { %2252 = vmatmul.mubr.msk.bf16.gmra.mxu1 %vm167_vm2, %v1914_v26  ;;  %v1383_v26 = vsel %vm1348_vm7, %v1373_v41, %v1382_v58  ;;  %v1408_v41 = vrot.slane %v1406_v30, 3 }
  0xb8   :  { %2280 = vmatmul.mubr.msk.bf16.gmra.mxu0 %vm167_vm2, %v1194_v2  ;;  %2255 = vmatprep.mubr.msk.bf16.mxu1 %vm2451_vm0, %v2450_v0 }
  0xb9   :  { %2283 = vmatprep.mubr.msk.bf16.mxu0 %vm2451_vm0, %v2450_v0 }
  0xbf   :  { %2256 = vmatmul.mubr.msk.bf16.gmra.mxu1 %vm167_vm2, %v1915_v40 }
  0xc0   :  { %2284 = vmatmul.mubr.msk.bf16.gmra.mxu0 %vm167_vm2, %v1196_v4  ;;  %2259 = vmatprep.mubr.msk.bf16.mxu1 %vm2451_vm0, %v2450_v0  ;;  %v1390_v4 = vrot.slane %v1388_v60, 3 }
  0xc1   :  { %2287 = vmatprep.mubr.msk.bf16.mxu0 %vm2451_vm0, %v2450_v0 }
  0xc2   :  { %v1391_v8 = vor.u32 %v1390_v4, %v1387_v39 }
  0xc4   :  { %v1392_v18 = vsel %vm1348_vm7, %v1382_v58, %v1391_v8 }
  0xc7   :  { %2260 = vmatmul.mubr.msk.bf16.gmra.mxu1 %vm167_vm2, %v1916_v53 }
  0xc8   :  { %2288 = vmatmul.mubr.msk.bf16.gmra.mxu0 %vm167_vm2, %v1198_v6  ;;  %2263 = vmatprep.mubr.msk.bf16.mxu1 %vm2451_vm0, %v2450_v0  ;;  %v1570_v6 = vrot.slane %v2849_v11, 3 }
  0xc9   :  { %2291 = vmatprep.mubr.msk.bf16.mxu0 %vm2451_vm0, %v2450_v0 }
  0xca   :  { %v1571_v16 = vsel %vm612_vm4, %v1568_v56, %v1570_v6  ;;  %v1573_v33 = vsel %vm612_vm4, %v1570_v6, %v1572_v24  ;;  %v1415_v56 = vshll.u32 %v2424_v42, 16  ;;  %v1576_v6 = vrot.slane %v2894_v7, 3 }
  0xcf   :  { %2264 = vmatmul.mubr.msk.bf16.gmra.mxu1 %vm167_vm2, %v1917_v17 }
  0xd0   :  { %2292 = vmatmul.mubr.msk.bf16.gmra.mxu0 %vm167_vm2, %v1200_v14  ;;  %2303 = vmatprep.mubr.msk.bf16.mxu1 %vm2451_vm0, %v2450_v0 }
  0xd1   :  { %2295 = vmatprep.mubr.msk.bf16.mxu0 %vm2451_vm0, %v2450_v0 }
  0xd7   :  { %v2935_v37 = vpop.f32.mrf.mxu1  ;;  %2304 = vmatmul.mubr.msk.bf16.vlgmr.msra.gmra.mxu1 %vm167_vm2, %v1365_v31 }
  0xd8   :  { %v2929_v34 = vpop.f32.mrf.mxu0  ;;  %2296 = vmatmul.mubr.msk.bf16.gmra.mxu0 %vm167_vm2, %v1202_v29  ;;  %2307 = vmatprep.mubr.msk.bf16.mxu1 %vm2451_vm0, %v2450_v0  ;;  %v1403_v29 = vshrl.u32 %v2894_v7, 16 }
  0xd9   :  { %2335 = vmatprep.mubr.msk.bf16.mxu0 %vm2451_vm0, %v2450_v0  ;;  %v2097_v44 = vpop.f32.mrf.mxu1 }
  0xda   :  { %v2081_v38 = vpop.f32.mrf.mxu0 }
  0xdb   :  { %v2945_v47 = vpop.f32.mrf.mxu1  ;;  %v1401_v38 = vsel %vm1348_vm7, %v1391_v8, %v1400_v28 }
  0xdc   :  { %v2942_v45 = vpop.f32.mrf.mxu0 }
  0xdd   :  { %v2098_v54 = vpop.f32.mrf.mxu1 }
  0xde   :  { %v2082_v48 = vpop.f32.mrf.mxu0  ;;  %v1412_v54 = vshrl.u32 %v2424_v42, 16 }
  0xdf   :  { %v2954_v10 = vpop.f32.mrf.mxu1  ;;  %2308 = vmatmul.mubr.msk.bf16.gmra.mxu1 %vm167_vm2, %v1374_v49  ;;  %v1574_v48 = vrot.slane %v2879_v5, 3 }
  0xe0   :  { %v2948_v55 = vpop.f32.mrf.mxu0  ;;  %2336 = vmatmul.mubr.msk.bf16.vlgmr.msra.gmra.mxu0 %vm167_vm2, %v1567_v46  ;;  %2311 = vmatprep.mubr.msk.bf16.mxu1 %vm2451_vm0, %v2450_v0 }
  0xe1   :  { %2339 = vmatprep.mubr.msk.bf16.mxu0 %vm2451_vm0, %v2450_v0  ;;  %v2101_v61 = vpop.f32.mrf.mxu1  ;;  %v1575_v60 = vsel %vm612_vm4, %v1572_v24, %v1574_v48 }
  0xe2   :  { %v2085_v12 = vpop.f32.mrf.mxu0 }
  0xe3   :  { %v2964_v2 = vpop.f32.mrf.mxu1 }
  0xe4   :  { %v2961_v25 = vpop.f32.mrf.mxu0 }
  0xe5   :  { %v2102_v40 = vpop.f32.mrf.mxu1 }
  0xe6   :  { %v2086_v57 = vpop.f32.mrf.mxu0 }
  0xe7   :  { %v2973_v53 = vpop.f32.mrf.mxu1  ;;  %2312 = vmatmul.mubr.msk.bf16.gmra.mxu1 %vm167_vm2, %v1383_v26  ;;  %v1414_v26 = vrot.slane %v1412_v54, 2 }
  0xe8   :  { %v2967_v52 = vpop.f32.mrf.mxu0  ;;  %2340 = vmatmul.mubr.msk.bf16.gmra.mxu0 %vm167_vm2, %v1569_v62  ;;  %2315 = vmatprep.mubr.msk.bf16.mxu1 %vm2451_vm0, %v2450_v0 }
  0xe9   :  { %2343 = vmatprep.mubr.msk.bf16.mxu0 %vm2451_vm0, %v2450_v0  ;;  %v2105_v1 = vpop.f32.mrf.mxu1 }
  0xea   :  { %v2089_v63 = vpop.f32.mrf.mxu0 }
  0xeb   :  { %v2983_v17 = vpop.f32.mrf.mxu1 }
  0xec   :  { %v2980_v14 = vpop.f32.mrf.mxu0 }
  0xed   :  { %v2106_v21 = vpop.f32.mrf.mxu1 }
  0xee   :  { %v2090_v11 = vpop.f32.mrf.mxu0 }
  0xef   :  { %v338_v15 = vpop.f32.mrf.mxu1  ;;  %2316 = vmatmul.mubr.msk.bf16.gmra.mxu1 %vm167_vm2, %v1392_v18  ;;  %v1577_v11 = vsel %vm612_vm4, %v1574_v48, %v1576_v6 }
  0xf0   :  { %v2986_v23 = vpop.f32.mrf.mxu0  ;;  %2344 = vmatmul.mubr.msk.bf16.gmra.mxu0 %vm167_vm2, %v1571_v16  ;;  %v339_v22 = vadd.f32 %v338_v15, %v2929_v34  ;;  %2319 = vmatprep.mubr.msk.bf16.mxu1 %vm2451_vm0, %v2450_v0  ;;  %v1405_v34 = vrot.slane %v1403_v29, 2  ;;  %v1578_v15 = vrot.slane %v2424_v42, 3 }
  0xf1   :  { %2347 = vmatprep.mubr.msk.bf16.mxu0 %vm2451_vm0, %v2450_v0  ;;  %v2113_v31 = vpop.f32.mrf.mxu1 }
  0xf2   :  { %v2093_v27 = vpop.f32.mrf.mxu0  ;;  %v1409_v51 = vor.u32 %v1408_v41, %v1405_v34  ;;  %v1579_v31 = vsel %vm612_vm4, %v1576_v6, %v1578_v15 }
  0xf3   :  { %v341_v3 = vpop.f32.mrf.mxu1 }
  0xf4   :  { %v2998_v32 = vpop.f32.mrf.mxu0  ;;  %v342_v36 = vadd.f32 %v341_v3, %v2942_v45  ;;  %v1410_v57 = vsel %vm1348_vm7, %v1400_v28, %v1409_v51 }
  0xf5   :  { %v2114_v43 = vpop.f32.mrf.mxu1 }
  0xf6   :  { %v2094_v35 = vpop.f32.mrf.mxu0 }
  0xf7   :  { %v346_v45 = vpop.f32.mrf.mxu1  ;;  %2320 = vmatmul.mubr.msk.bf16.gmra.mxu1 %vm167_vm2, %v1401_v38 }
  0xf8   :  { %v485_v44 = vpop.f32.mrf.mxu0  ;;  %2348 = vmatmul.mubr.msk.bf16.gmra.mxu0 %vm167_vm2, %v1573_v33  ;;  %v347_v50 = vadd.f32 %v346_v45, %v2948_v55  ;;  %2323 = vmatprep.mubr.msk.bf16.mxu1 %vm2451_vm0, %v2450_v0  ;;  %v1417_v55 = vrot.slane %v1415_v56, 3 }
  0xf9   :  { %v3007_v46 = vadd.f32 %v485_v44, %v339_v22  ;;  %2351 = vmatprep.mubr.msk.bf16.mxu0 %vm2451_vm0, %v2450_v0  ;;  %v2117_v12 = vpop.f32.mrf.mxu1 }
  0xfa   :  { %v2145_v49 = vpop.f32.mrf.mxu0  ;;  %v1418_v9 = vor.u32 %v1417_v55, %v1414_v26 }
  0xfb   :  { %v349_v61 = vpop.f32.mrf.mxu1 }
  0xfc   :  { %v488_v58 = vpop.f32.mrf.mxu0  ;;  %v350_v62 = vadd.f32 %v349_v61, %v2961_v25  ;;  %v1419_v20 = vsel %vm1348_vm7, %v1409_v51, %v1418_v9 }
  0xfd   :  { %v3016_v59 = vadd.f32 %v488_v58, %v342_v36  ;;  %v2118_v39 = vpop.f32.mrf.mxu1 }
  0xfe   :  { %v2146_v5 = vpop.f32.mrf.mxu0 }
  0xff   :  { %v354_v63 = vpop.f32.mrf.mxu1  ;;  %2324 = vmatmul.mubr.msk.bf16.gmra.mxu1 %vm167_vm2, %v1410_v57 }
 0x100   :  { %v493_v4 = vpop.f32.mrf.mxu0  ;;  %2352 = vmatmul.mubr.msk.bf16.gmra.mxu0 %vm167_vm2, %v1575_v60  ;;  %v355_v25 = vadd.f32 %v354_v63, %v2967_v52  ;;  %2327 = vmatprep.mubr.msk.bf16.mxu1 %vm2451_vm0, %v2450_v0 }
 0x101   :  { %v3022_v40 = vadd.f32 %v493_v4, %v347_v50  ;;  %2355 = vmatprep.mubr.msk.bf16.mxu0 %vm2451_vm0, %v2450_v0  ;;  %v2121_v13 = vpop.f32.mrf.mxu1 }
 0x102   :  { %v2149_v8 = vpop.f32.mrf.mxu0 }
 0x103   :  { %v357_v18 = vpop.f32.mrf.mxu1 }
 0x104   :  { %v496_v1 = vpop.f32.mrf.mxu0  ;;  %v358_v7 = vadd.f32 %v357_v18, %v2980_v14 }
 0x105   :  { %v3031_v16 = vadd.f32 %v496_v1, %v350_v62  ;;  %v2122_v21 = vpop.f32.mrf.mxu1 }
 0x106   :  { %v2150_v19 = vpop.f32.mrf.mxu0 }
 0x107   :  { %v362_v27 = vpop.f32.mrf.mxu1  ;;  %2328 = vmatmul.mubr.msk.bf16.gmra.mxu1 %vm167_vm2, %v1419_v20 }
 0x108   :  { %v501_v24 = vpop.f32.mrf.mxu0  ;;  %2356 = vmatmul.mubr.msk.bf16.gmra.mxu0 %vm167_vm2, %v1577_v11  ;;  %v363_v28 = vadd.f32 %v362_v27, %v2986_v23 }
 0x109   :  { %v3037_v52 = vadd.f32 %v501_v24, %v355_v25  ;;  %2359 = vmatprep.mubr.msk.bf16.mxu0 %vm2451_vm0, %v2450_v0  ;;  %v2125_v29 = vpop.f32.mrf.mxu1 }
 0x10a   :  { %v2153_v22 = vpop.f32.mrf.mxu0 }
 0x10b   :  { %v365_v33 = vpop.f32.mrf.mxu1 }
 0x10c   :  { %v504_v14 = vpop.f32.mrf.mxu0  ;;  %v366_v35 = vadd.f32 %v365_v33, %v2998_v32 }
 0x10d   :  { %v3043_v30 = vadd.f32 %v504_v14, %v358_v7  ;;  %v2126_v36 = vpop.f32.mrf.mxu1 }
 0x10e   :  { %v2154_v3 = vpop.f32.mrf.mxu0 }
 0x10f   :  { %v370_v34 = vpop.f32.mrf.mxu1 }
 0x110   :  { %v509_v38 = vpop.f32.mrf.mxu0  ;;  %2360 = vmatmul.mubr.msk.bf16.gmra.mxu0 %vm167_vm2, %v1579_v31  ;;  %v371_v23 = vadd.f32 %v370_v34, %v2935_v37 }
 0x111   :  { %v3048_v0 = vadd.f32 %v509_v38, %v363_v28  ;;  %v2129_v42 = vpop.f32.mrf.mxu1 }
 0x112   :  { %v2157_v41 = vpop.f32.mrf.mxu0 }
 0x113   :  { %v373_v48 = vpop.f32.mrf.mxu1 }
 0x114   :  { %v512_v43 = vpop.f32.mrf.mxu0  ;;  %v374_v49 = vadd.f32 %v373_v48, %v2945_v47 }
 0x115   :  { %v3051_v44 = vadd.f32 %v512_v43, %v366_v35  ;;  %v2130_v50 = vpop.f32.mrf.mxu1 }
 0x116   :  { %v2158_v45 = vpop.f32.mrf.mxu0 }
 0x117   :  { %v378_v54 = vpop.f32.mrf.mxu1 }
 0x118   :  { %v517_v32 = vpop.f32.mrf.mxu0  ;;  %v379_v12 = vadd.f32 %v378_v54, %v2954_v10 }
 0x119   :  { %v3054_v51 = vadd.f32 %v517_v32, %v371_v23  ;;  %v2133_v58 = vpop.f32.mrf.mxu1 }
 0x11a   :  { %v2161_v56 = vpop.f32.mrf.mxu0 }
 0x11b   :  { %v381_v37 = vpop.f32.mrf.mxu1 }
 0x11c   :  { %v520_v60 = vpop.f32.mrf.mxu0  ;;  %v382_v62 = vadd.f32 %v381_v37, %v2964_v2 }
 0x11d   :  { %v3057_v61 = vadd.f32 %v520_v60, %v374_v49  ;;  %v2134_v57 = vpop.f32.mrf.mxu1 }
 0x11e   :  { %v2162_v5 = vpop.f32.mrf.mxu0 }
 0x11f   :  { %v386_v47 = vpop.f32.mrf.mxu1 }
 0x120   :  { %v525_v26 = vpop.f32.mrf.mxu0  ;;  %v387_v4 = vadd.f32 %v386_v47, %v2973_v53 }
 0x121   :  { %v3060_v55 = vadd.f32 %v525_v26, %v379_v12  ;;  %v2137_v6 = vpop.f32.mrf.mxu1 }
 0x122   :  { %v2165_v39 = vpop.f32.mrf.mxu0 }
 0x123   :  { %v389_v10 = vpop.f32.mrf.mxu1 }
 0x124   :  { %v528_v63 = vpop.f32.mrf.mxu0  ;;  %v390_v9 = vadd.f32 %v389_v10, %v2983_v17 }
 0x125   :  { %v3063_v8 = vadd.f32 %v528_v63, %v382_v62  ;;  %v2138_v13 = vpop.f32.mrf.mxu1 }
 0x126   :  { %v2166_v25 = vpop.f32.mrf.mxu0 }
 0x127   :  { %v695_v2 = vpop.f32.mrf.mxu1 }
 0x128   :  { %v533_v1 = vpop.f32.mrf.mxu0  ;;  %v750_v19 = vadd.f32 %v695_v2, %v3007_v46 }
 0x129   :  { %v3066_v11 = vadd.f32 %v533_v1, %v387_v4  ;;  %v2177_v7 = vpop.f32.mrf.mxu1 }
 0x12a   :  { %v2169_v18 = vpop.f32.mrf.mxu0 }
 0x12b   :  { %v698_v53 = vpop.f32.mrf.mxu1 }
 0x12c   :  { %v536_v20 = vpop.f32.mrf.mxu0  ;;  %v751_v15 = vadd.f32 %v698_v53, %v3016_v59 }
 0x12d   :  { %v3069_v21 = vadd.f32 %v536_v20, %v390_v9  ;;  %v2178_v27 = vpop.f32.mrf.mxu1 }
 0x12e   :  { %v2170_v24 = vpop.f32.mrf.mxu0 }
 0x12f   :  { %v703_v17 = vpop.f32.mrf.mxu1 }
 0x130   :  { %v912_v22 = vpop.f32.mrf.mxu0  ;;  %v752_v14 = vadd.f32 %v703_v17, %v3022_v40 }
 0x131   :  { %v3072_v28 = vadd.f32 %v912_v22, %v750_v19  ;;  %v2181_v31 = vpop.f32.mrf.mxu1 }
 0x132   :  { %v2209_v29 = vpop.f32.mrf.mxu0 }
 0x133   :  { %v706_v46 = vpop.f32.mrf.mxu1 }
 0x134   :  { %v915_v33 = vpop.f32.mrf.mxu0  ;;  %v753_v36 = vadd.f32 %v706_v46, %v3031_v16 }
 0x135   :  { %v3075_v3 = vadd.f32 %v915_v33, %v751_v15  ;;  %v2182_v38 = vpop.f32.mrf.mxu1 }
 0x136   :  { %v2210_v35 = vpop.f32.mrf.mxu0 }
 0x137   :  { %v711_v59 = vpop.f32.mrf.mxu1 }
 0x138   :  { %v920_v34 = vpop.f32.mrf.mxu0  ;;  %v754_v42 = vadd.f32 %v711_v59, %v3037_v52 }
 0x139   :  { %v3078_v41 = vadd.f32 %v920_v34, %v752_v14  ;;  %v2185_v43 = vpop.f32.mrf.mxu1 }
 0x13a   :  { %v2213_v23 = vpop.f32.mrf.mxu0 }
 0x13b   :  { %v714_v40 = vpop.f32.mrf.mxu1 }
 0x13c   :  { %v923_v48 = vpop.f32.mrf.mxu0  ;;  %v755_v50 = vadd.f32 %v714_v40, %v3043_v30 }
 0x13d   :  { %v3081_v45 = vadd.f32 %v923_v48, %v753_v36  ;;  %v2186_v32 = vpop.f32.mrf.mxu1 }
 0x13e   :  { %v2214_v49 = vpop.f32.mrf.mxu0 }
 0x13f   :  { %v719_v16 = vpop.f32.mrf.mxu1 }
 0x140   :  { %v928_v54 = vpop.f32.mrf.mxu0  ;;  %v756_v58 = vadd.f32 %v719_v16, %v3048_v0 }
 0x141   :  { %v3084_v56 = vadd.f32 %v928_v54, %v754_v42  ;;  %v2189_v60 = vpop.f32.mrf.mxu1 }
 0x142   :  { %v2217_v12 = vpop.f32.mrf.mxu0 }
 0x143   :  { %v722_v52 = vpop.f32.mrf.mxu1 }
 0x144   :  { %v931_v37 = vpop.f32.mrf.mxu0  ;;  %v757_v57 = vadd.f32 %v722_v52, %v3051_v44 }
 0x145   :  { %v3087_v5 = vadd.f32 %v931_v37, %v755_v50  ;;  %v2190_v26 = vpop.f32.mrf.mxu1 }
 0x146   :  { %v2218_v62 = vpop.f32.mrf.mxu0 }
 0x147   :  { %v727_v30 = vpop.f32.mrf.mxu1 }
 0x148   :  { %v936_v47 = vpop.f32.mrf.mxu0  ;;  %v758_v6 = vadd.f32 %v727_v30, %v3054_v51 }
 0x149   :  { %v3090_v39 = vadd.f32 %v936_v47, %v756_v58  ;;  %v2193_v63 = vpop.f32.mrf.mxu1 }
 0x14a   :  { %v2221_v4 = vpop.f32.mrf.mxu0 }
 0x14b   :  { %v730_v0 = vpop.f32.mrf.mxu1 }
 0x14c   :  { %v939_v10 = vpop.f32.mrf.mxu0  ;;  %v759_v13 = vadd.f32 %v730_v0, %v3057_v61 }
 0x14d   :  { %v3093_v25 = vadd.f32 %v939_v10, %v757_v57  ;;  %v2194_v1 = vpop.f32.mrf.mxu1 }
 0x14e   :  { %v2222_v9 = vpop.f32.mrf.mxu0 }
 0x14f   :  { %v735_v44 = vpop.f32.mrf.mxu1 }
 0x150   :  { %v944_v2 = vpop.f32.mrf.mxu0  ;;  %v760_v7 = vadd.f32 %v735_v44, %v3060_v55 }
 0x151   :  { %v3096_v18 = vadd.f32 %v944_v2, %v758_v6  ;;  %v2197_v20 = vpop.f32.mrf.mxu1 }
 0x152   :  { %v2225_v19 = vpop.f32.mrf.mxu0 }
 0x153   :  { %v738_v51 = vpop.f32.mrf.mxu1 }
 0x154   :  { %v947_v53 = vpop.f32.mrf.mxu0  ;;  %v761_v27 = vadd.f32 %v738_v51, %v3063_v8 }
 0x155   :  { %v3099_v24 = vadd.f32 %v947_v53, %v759_v13  ;;  %v2198_v22 = vpop.f32.mrf.mxu1 }
 0x156   :  { %v2226_v15 = vpop.f32.mrf.mxu0 }
 0x157   :  { %v743_v61 = vpop.f32.mrf.mxu1 }
 0x158   :  { %v952_v17 = vpop.f32.mrf.mxu0  ;;  %v762_v31 = vadd.f32 %v743_v61, %v3066_v11 }
 0x159   :  { %v3102_v29 = vadd.f32 %v952_v17, %v760_v7  ;;  %v2201_v33 = vpop.f32.mrf.mxu1 }
 0x15a   :  { %v2229_v14 = vpop.f32.mrf.mxu0 }
 0x15b   :  { %v746_v55 = vpop.f32.mrf.mxu1 }
 0x15c   :  { %v955_v46 = vpop.f32.mrf.mxu0  ;;  %v763_v38 = vadd.f32 %v746_v55, %v3069_v21 }
 0x15d   :  { %v3105_v35 = vadd.f32 %v955_v46, %v761_v27  ;;  %v2202_v34 = vpop.f32.mrf.mxu1 }
 0x15e   :  { %v2230_v36 = vpop.f32.mrf.mxu0 }
 0x15f   :  { %v1060_v8 = vpop.f32.mrf.mxu1 }
 0x160   :  { %v960_v59 = vpop.f32.mrf.mxu0 }
 0x161   :  { %v3108_v23 = vadd.f32 %v960_v59, %v762_v31  ;;  %v2241_v43 = vpop.f32.mrf.mxu1 }
 0x162   :  { %v2233_v42 = vpop.f32.mrf.mxu0 }
 0x163   :  { %v1063_v49 = vpop.f32.mrf.mxu1 }
 0x164   :  { %v963_v48 = vpop.f32.mrf.mxu0 }
 0x165   :  { %v3110_v40 = vadd.f32 %v963_v48, %v763_v38  ;;  %v2242_v50 = vpop.f32.mrf.mxu1 }
 0x166   :  { %v2234_v11 = vpop.f32.mrf.mxu0 }
 0x167   :  { %v3112_v54 = vpop.f32.mrf.mxu1 }
 0x168   :  { %v1270_v32 = vpop.f32.mrf.mxu0 }
 0x169   :  { %v2245_v12 = vpop.f32.mrf.mxu1 }
 0x16a   :  { %v2273_v16 = vpop.f32.mrf.mxu0 }
 0x16b   :  { %v3114_v21 = vpop.f32.mrf.mxu1 }
 0x16c   :  { %v1273_v58 = vpop.f32.mrf.mxu0 }
 0x16d   :  { %v2246_v37 = vpop.f32.mrf.mxu1 }
 0x16e   :  { %v2274_v60 = vpop.f32.mrf.mxu0  ;;  %v1115_v37 = vadd.f32 %v1060_v8, %v3072_v28  ;;  %v3170_v28 = vld [vmem:[%s3295_s3] ss:$0 sm:$0xff] }
 0x16f   :  { %v3118_v62 = vpop.f32.mrf.mxu1 }
 0x170   :  { %v3116_v52 = vpop.f32.mrf.mxu0 }
 0x171   :  { %v2249_v26 = vpop.f32.mrf.mxu1 }
 0x172   :  { %v2277_v57 = vpop.f32.mrf.mxu0 }
 0x173   :  { %v3122_v30 = vpop.f32.mrf.mxu1 }
 0x174   :  { %v3120_v47 = vpop.f32.mrf.mxu0 }
 0x175   :  { %v2250_v6 = vpop.f32.mrf.mxu1 }
 0x176   :  { %v2278_v4 = vpop.f32.mrf.mxu0 }
 0x177   :  { %v3126_v10 = vpop.f32.mrf.mxu1  ;;  %v1325_v4 = vadd.f32 %v1270_v32, %v1115_v37 }
 0x178   :  { %v3124_v63 = vpop.f32.mrf.mxu0 }
 0x179   :  { %v2253_v9 = vpop.f32.mrf.mxu1 }
 0x17a   :  { %v2281_v0 = vpop.f32.mrf.mxu0  ;;  %v1116_v9 = vadd.f32 %v1063_v49, %v3075_v3  ;;  %v1117_v3 = vadd.f32 %v3112_v54, %v3078_v41 }
 0x17b   :  { %v3130_v1 = vpop.f32.mrf.mxu1 }
 0x17c   :  { %v3128_v13 = vpop.f32.mrf.mxu0 }
 0x17d   :  { %v2254_v44 = vpop.f32.mrf.mxu1 }
 0x17e   :  { %v2282_v2 = vpop.f32.mrf.mxu0 }
 0x17f   :  { %v3134_v7 = vpop.f32.mrf.mxu1 }
 0x180   :  { %v3132_v19 = vpop.f32.mrf.mxu0 }
 0x181   :  { %v2257_v53 = vpop.f32.mrf.mxu1 }
 0x182   :  { %v2285_v20 = vpop.f32.mrf.mxu0  ;;  %v3165_v53 = vld [vmem:[%s3294_s2] ss:$0 sm:$0xff] }
 0x183   :  { %v3138_v15 = vpop.f32.mrf.mxu1 }
 0x184   :  { %v3136_v51 = vpop.f32.mrf.mxu0 }
 0x185   :  { %v2258_v22 = vpop.f32.mrf.mxu1 }
 0x186   :  { %v2286_v27 = vpop.f32.mrf.mxu0 }
 0x187   :  { %v3142_v61 = vpop.f32.mrf.mxu1  ;;  %v1326_v27 = vadd.f32 %v1273_v58, %v1116_v9 }
 0x188   :  { %v3140_v17 = vpop.f32.mrf.mxu0 }
 0x189   :  { %v2261_v31 = vpop.f32.mrf.mxu1 }
 0x18a   :  { %v2289_v14 = vpop.f32.mrf.mxu0 }
 0x18b   :  { %v3146_v46 = vpop.f32.mrf.mxu1 }
 0x18c   :  { %v3144_v33 = vpop.f32.mrf.mxu0 }
 0x18d   :  { %v2262_v36 = vpop.f32.mrf.mxu1 }
 0x18e   :  { %v2290_v55 = vpop.f32.mrf.mxu0  ;;  %v1327_v36 = vadd.f32 %v3116_v52, %v1117_v3 }
 0x18f   :  { %v3150_v34 = vpop.f32.mrf.mxu1 }
 0x190   :  { %v3148_v38 = vpop.f32.mrf.mxu0 }
 0x191   :  { %v2265_v42 = vpop.f32.mrf.mxu1 }
 0x192   :  { %v2293_v59 = vpop.f32.mrf.mxu0 }
 0x193   :  { %v3154_v48 = vpop.f32.mrf.mxu1 }
 0x194   :  { %v3152_v43 = vpop.f32.mrf.mxu0 }
 0x195   :  { %v2266_v50 = vpop.f32.mrf.mxu1 }
 0x196   :  { %v2294_v11 = vpop.f32.mrf.mxu0  ;;  %v1118_v50 = vadd.f32 %v3114_v21, %v3081_v45 }
 0x197   :  { %v1487_v12 = vpop.f32.mrf.mxu1 }
 0x198   :  { %v3156_v16 = vpop.f32.mrf.mxu0  ;;  %v1542_v2 = vadd.f32 %v1487_v12, %v1325_v4 }
 0x199   :  { %v2305_v57 = vpop.f32.mrf.mxu1 }
 0x19a   :  { %v2297_v60 = vpop.f32.mrf.mxu0  ;;  %v1328_v57 = vadd.f32 %v3120_v47, %v1118_v50 }
 0x19b   :  { %v1490_v6 = vpop.f32.mrf.mxu1 }
 0x19c   :  { %v3159_v26 = vpop.f32.mrf.mxu0  ;;  %v1543_v49 = vadd.f32 %v1490_v6, %v1326_v27 }
 0x19d   :  { %v2306_v44 = vpop.f32.mrf.mxu1 }
 0x19e   :  { %v2298_v0 = vpop.f32.mrf.mxu0 }
 0x19f   :  { %v1495_v14 = vpop.f32.mrf.mxu1 }
 0x1a0   :  { %v1647_v20 = vpop.f32.mrf.mxu0  ;;  %v1544_v12 = vadd.f32 %v1495_v14, %v1327_v36 }
 0x1a1   :  { %v1702_v22 = vadd.f32 %v1647_v20, %v1542_v2  ;;  %v2309_v31 = vpop.f32.mrf.mxu1  ;;  %v1119_v2 = vadd.f32 %v3118_v62, %v3084_v56  ;;  %v1120_v56 = vadd.f32 %v3122_v30, %v3087_v5  ;;  %v1121_v5 = vadd.f32 %v3126_v10, %v3090_v39 }
 0x1a2   :  { %v2337_v8 = vpop.f32.mrf.mxu0  ;;  %v1122_v39 = vadd.f32 %v3130_v1, %v3093_v25  ;;  %v1123_v25 = vadd.f32 %v3134_v7, %v3096_v18  ;;  %v1124_v18 = vadd.f32 %v3138_v15, %v3099_v24  ;;  %v1125_v24 = vadd.f32 %v3142_v61, %v3102_v29 }
 0x1a3   :  { %v1723_v32 = vmul.f32 %v3165_v53, %v1702_v22  ;;  %v1498_v42 = vpop.f32.mrf.mxu1  ;;  %v1329_v27 = vadd.f32 %v3124_v63, %v1119_v2  ;;  %v1330_v36 = vadd.f32 %v3128_v13, %v1120_v56  ;;  %v1126_v29 = vadd.f32 %v3146_v46, %v3105_v35 }
 0x1a4   :  { %v1650_v55 = vpop.f32.mrf.mxu0  ;;  %v1545_v45 = vadd.f32 %v1498_v42, %v1328_v57  ;;  %v1127_v35 = vadd.f32 %v3150_v34, %v3108_v23  ;;  %v1128_v23 = vadd.f32 %v3154_v48, %v3110_v40 }
 0x1a5   :  { %v1744_v58 = vadd.f32 %v3170_v28, %v1723_v32  ;;  %v1703_v59 = vadd.f32 %v1650_v55, %v1543_v49  ;;  %v2310_v41 = vpop.f32.mrf.mxu1 }
 0x1a6   :  { %v2338_v11 = vpop.f32.mrf.mxu0  ;;  %v1331_v41 = vadd.f32 %v3132_v19, %v1121_v5 }
 0x1a7   :  { %v1758_v60 = vmax.f32 %v1744_v58, 0.0  ;;  %v1724_v37 = vmul.f32 %v3165_v53, %v1703_v59  ;;  %v1503_v0 = vpop.f32.mrf.mxu1 }
 0x1a8   :  { %v1655_v54 = vpop.f32.mrf.mxu0  ;;  %v1546_v62 = vadd.f32 %v1503_v0, %v1329_v27 }
 0x1a9   :  { %v1980_v4 = vpack.c.bf16 %v1758_v60, %v1758_v60  ;;  %v1745_v52 = vadd.f32 %v3170_v28, %v1724_v37  ;;  %v1704_v6 = vadd.f32 %v1655_v54, %v1544_v12  ;;  %v2313_v20 = vpop.f32.mrf.mxu1 }
 0x1aa   :  { %v2341_v9 = vpop.f32.mrf.mxu0 }
 0x1ab   :  { %1829 = vst.msk [vmem:[%s3296_s4] sm:$0xf] %vm1828_vm8, %v1980_v4  ;;  %v1759_v21 = vmax.f32 %v1745_v52, 0.0  ;;  %v1725_v44 = vmul.f32 %v3165_v53, %v1704_v6  ;;  %v1506_v3 = vpop.f32.mrf.mxu1 }
 0x1ac   :  { %v1658_v47 = vpop.f32.mrf.mxu0  ;;  %v1547_v30 = vadd.f32 %v1506_v3, %v1330_v36  ;;  %v1333_v3 = vadd.f32 %v3140_v17, %v1123_v25 }
 0x1ad   :  { %v1981_v22 = vpack.c.bf16 %v1759_v21, %v1759_v21  ;;  %v1746_v14 = vadd.f32 %v3170_v28, %v1725_v44  ;;  %v1705_v8 = vadd.f32 %v1658_v47, %v1545_v45  ;;  %v2314_v55 = vpop.f32.mrf.mxu1  ;;  %v1332_v45 = vadd.f32 %v3136_v51, %v1122_v39 }
 0x1ae   :  { %v2342_v49 = vpop.f32.mrf.mxu0 }
 0x1af   :  { %1830 = vst.msk [vmem:[%s3296_s4 + $0x4] sm:$0xf] %vm1828_vm8, %v1981_v22  ;;  %v1760_v32 = vmax.f32 %v1746_v14, 0.0  ;;  %v1726_v31 = vmul.f32 %v3165_v53, %v1705_v8  ;;  %v1511_v11 = vpop.f32.mrf.mxu1 }
 0x1b0   :  { %v1663_v63 = vpop.f32.mrf.mxu0  ;;  %v1548_v10 = vadd.f32 %v1511_v11, %v1331_v41 }
 0x1b1   :  { %v1982_v58 = vpack.c.bf16 %v1760_v32, %v1760_v32  ;;  %v1747_v59 = vadd.f32 %v3170_v28, %v1726_v31  ;;  %v1706_v42 = vadd.f32 %v1663_v63, %v1546_v62  ;;  %v2317_v37 = vpop.f32.mrf.mxu1 }
 0x1b2   :  { %v2345_v50 = vpop.f32.mrf.mxu0  ;;  %v1335_v37 = vadd.f32 %v3148_v38, %v1125_v24 }
 0x1b3   :  { %1831 = vst.msk [vmem:[%s3296_s4 + $0x8] sm:$0xf] %vm1828_vm8, %v1982_v58  ;;  %v1761_v12 = vmax.f32 %v1747_v59, 0.0  ;;  %v1727_v60 = vmul.f32 %v3165_v53, %v1706_v42  ;;  %v1514_v52 = vpop.f32.mrf.mxu1  ;;  %v1334_v58 = vadd.f32 %v3144_v33, %v1124_v18 }
 0x1b4   :  { %v1666_v13 = vpop.f32.mrf.mxu0  ;;  %v1549_v1 = vadd.f32 %v1514_v52, %v1332_v45 }
 0x1b5   :  { %v1983_v54 = vpack.c.bf16 %v1761_v12, %v1761_v12  ;;  %v1748_v57 = vadd.f32 %v3170_v28, %v1727_v60  ;;  %v1707_v4 = vadd.f32 %v1666_v13, %v1547_v30  ;;  %v2318_v2 = vpop.f32.mrf.mxu1 }
 0x1b6   :  { %v2346_v6 = vpop.f32.mrf.mxu0 }
 0x1b7   :  { %1832 = vst.msk [vmem:[%s3296_s4 + $0xc] sm:$0xf] %vm1828_vm8, %v1983_v54  ;;  %v1762_v0 = vmax.f32 %v1748_v57, 0.0  ;;  %v1728_v9 = vmul.f32 %v3165_v53, %v1707_v4  ;;  %v1519_v47 = vpop.f32.mrf.mxu1 }
 0x1b8   :  { %v1671_v19 = vpop.f32.mrf.mxu0  ;;  %v1550_v7 = vadd.f32 %v1519_v47, %v1333_v3  ;;  %v1337_v47 = vadd.f32 %v3156_v16, %v1127_v35 }
 0x1b9   :  { %v1984_v21 = vpack.c.bf16 %v1762_v0, %v1762_v0  ;;  %v1749_v44 = vadd.f32 %v3170_v28, %v1728_v9  ;;  %v1708_v20 = vadd.f32 %v1671_v19, %v1548_v10  ;;  %v2321_v8 = vpop.f32.mrf.mxu1  ;;  %v1336_v10 = vadd.f32 %v3152_v43, %v1126_v29 }
 0x1ba   :  { %v2349_v27 = vpop.f32.mrf.mxu0 }
 0x1bb   :  { %1833 = vst.msk [vmem:[%s3296_s4 + $0x10] sm:$0xf] %vm1828_vm8, %v1984_v21  ;;  %v1763_v22 = vmax.f32 %v1749_v44, 0.0  ;;  %v1729_v14 = vmul.f32 %v3165_v53, %v1708_v20  ;;  %v1522_v32 = vpop.f32.mrf.mxu1 }
 0x1bc   :  { %v1674_v51 = vpop.f32.mrf.mxu0  ;;  %v1551_v15 = vadd.f32 %v1522_v32, %v1334_v58 }
 0x1bd   :  { %v1985_v49 = vpack.c.bf16 %v1763_v22, %v1763_v22  ;;  %v1750_v56 = vadd.f32 %v3170_v28, %v1729_v14  ;;  %v1709_v62 = vadd.f32 %v1674_v51, %v1549_v1  ;;  %v2322_v36 = vpop.f32.mrf.mxu1 }
 0x1be   :  { %v2350_v31 = vpop.f32.mrf.mxu0 }
 0x1bf   :  { %1834 = vst.msk [vmem:[%s3296_s4 + $0x14] sm:$0xf] %vm1828_vm8, %v1985_v49  ;;  %v1764_v55 = vmax.f32 %v1750_v56, 0.0  ;;  %v1730_v63 = vmul.f32 %v3165_v53, %v1709_v62  ;;  %v1527_v50 = vpop.f32.mrf.mxu1  ;;  %v1338_v49 = vadd.f32 %v3159_v26, %v1128_v23 }
 0x1c0   :  { %v1679_v17 = vpop.f32.mrf.mxu0  ;;  %v1552_v61 = vadd.f32 %v1527_v50, %v1335_v37 }
 0x1c1   :  { %v1986_v59 = vpack.c.bf16 %v1764_v55, %v1764_v55  ;;  %v1751_v42 = vadd.f32 %v3170_v28, %v1730_v63  ;;  %v1710_v11 = vadd.f32 %v1679_v17, %v1550_v7  ;;  %v2325_v60 = vpop.f32.mrf.mxu1 }
 0x1c2   :  { %v2353_v5 = vpop.f32.mrf.mxu0 }
 0x1c3   :  { %1835 = vst.msk [vmem:[%s3296_s4 + $0x18] sm:$0xf] %vm1828_vm8, %v1986_v59  ;;  %v1765_v30 = vmax.f32 %v1751_v42, 0.0  ;;  %v1731_v12 = vmul.f32 %v3165_v53, %v1710_v11  ;;  %v1530_v57 = vpop.f32.mrf.mxu1 }
 0x1c4   :  { %v1682_v33 = vpop.f32.mrf.mxu0  ;;  %v1553_v46 = vadd.f32 %v1530_v57, %v1336_v10 }
 0x1c5   :  { %v1987_v13 = vpack.c.bf16 %v1765_v30, %v1765_v30  ;;  %v1752_v41 = vadd.f32 %v3170_v28, %v1731_v12  ;;  %v1711_v54 = vadd.f32 %v1682_v33, %v1551_v15  ;;  %v2326_v39 = vpop.f32.mrf.mxu1 }
 0x1c6   :  { %v2354_v4 = vpop.f32.mrf.mxu0 }
 0x1c7   :  { %1836 = vst.msk [vmem:[%s3296_s4 + $0x1c] sm:$0xf] %vm1828_vm8, %v1987_v13  ;;  %v1766_v52 = vmax.f32 %v1752_v41, 0.0  ;;  %v1732_v6 = vmul.f32 %v3165_v53, %v1711_v54  ;;  %v1535_v19 = vpop.f32.mrf.mxu1 }
 0x1c8   :  { %v1687_v38 = vpop.f32.mrf.mxu0  ;;  %v1554_v34 = vadd.f32 %v1535_v19, %v1337_v47 }
 0x1c9   :  { %v1988_v0 = vpack.c.bf16 %v1766_v52, %v1766_v52  ;;  %v1753_v9 = vadd.f32 %v3170_v28, %v1732_v6  ;;  %v1712_v2 = vadd.f32 %v1687_v38, %v1552_v61  ;;  %v2329_v20 = vpop.f32.mrf.mxu1 }
 0x1ca   :  { %v2357_v45 = vpop.f32.mrf.mxu0 }
 0x1cb   :  { %1837 = vst.msk [vmem:[%s3296_s4 + $0x20] sm:$0xf] %vm1828_vm8, %v1988_v0  ;;  %v1767_v21 = vmax.f32 %v1753_v9, 0.0  ;;  %v1733_v44 = vmul.f32 %v3165_v53, %v1712_v2  ;;  %v1538_v22 = vpop.f32.mrf.mxu1 }
 0x1cc   :  { %v1690_v43 = vpop.f32.mrf.mxu0  ;;  %v1555_v40 = vadd.f32 %v1538_v22, %v1338_v49 }
 0x1cd   :  { %v1989_v27 = vpack.c.bf16 %v1767_v21, %v1767_v21  ;;  %v1754_v25 = vadd.f32 %v3170_v28, %v1733_v44  ;;  %v1713_v1 = vadd.f32 %v1690_v43, %v1553_v46  ;;  %v2330_v3 = vpop.f32.mrf.mxu1 }
 0x1ce   :  { %v2358_v14 = vpop.f32.mrf.mxu0 }
 0x1cf   :  { %1838 = vst.msk [vmem:[%s3296_s4 + $0x24] sm:$0xf] %vm1828_vm8, %v1989_v27  ;;  %v1768_v8 = vmax.f32 %v1754_v25, 0.0  ;;  %v1734_v51 = vmul.f32 %v3165_v53, %v1713_v1 }
 0x1d0   :  { %v1695_v16 = vpop.f32.mrf.mxu0 }
 0x1d1   :  { %v1990_v56 = vpack.c.bf16 %v1768_v8, %v1768_v8  ;;  %v1755_v62 = vadd.f32 %v3170_v28, %v1734_v51  ;;  %v1714_v32 = vadd.f32 %v1695_v16, %v1554_v34 }
 0x1d2   :  { %v2361_v31 = vpop.f32.mrf.mxu0 }
 0x1d3   :  { %1839 = vst.msk [vmem:[%s3296_s4 + $0x28] sm:$0xf] %vm1828_vm8, %v1990_v56  ;;  %v1769_v48 = vmax.f32 %v1755_v62, 0.0  ;;  %v1735_v18 = vmul.f32 %v3165_v53, %v1714_v32 }
 0x1d4   :  { %v1698_v7 = vpop.f32.mrf.mxu0 }
 0x1d5   :  { %v1991_v55 = vpack.c.bf16 %v1769_v48, %v1769_v48  ;;  %v1756_v63 = vadd.f32 %v3170_v28, %v1735_v18  ;;  %v1715_v36 = vadd.f32 %v1698_v7, %v1555_v40 }
 0x1d6   :  { %v2362_v26 = vpop.f32.mrf.mxu0 }
 0x1d7   :  { %1840 = vst.msk [vmem:[%s3296_s4 + $0x2c] sm:$0xf] %vm1828_vm8, %v1991_v55  ;;  %v1770_v17 = vmax.f32 %v1756_v63, 0.0  ;;  %v1736_v58 = vmul.f32 %v3165_v53, %v1715_v36 }
 0x1d9   :  { %v1992_v59 = vpack.c.bf16 %v1770_v17, %v1770_v17  ;;  %v1757_v42 = vadd.f32 %v3170_v28, %v1736_v58 }
 0x1db   :  { %1841 = vst.msk [vmem:[%s3296_s4 + $0x30] sm:$0xf] %vm1828_vm8, %v1992_v59  ;;  %v1771_v11 = vmax.f32 %v1757_v42, 0.0 }
 0x1dd   :  { %v1993_v50 = vpack.c.bf16 %v1771_v11, %v1771_v11 }
 0x1df   :  { %1842 = vst.msk [vmem:[%s3296_s4 + $0x34] sm:$0xf] %vm1828_vm8, %v1993_v50 }
 0x1e0   :  { %1847 = vsyncpa [#allocation3], 1 }

</bundles_post_ra>
